<compile_context>
chip_gen: v5e
topology: v5e:2x2
jax: 0.10.0
libtpu: 0.0.40
codegen_flags: <defaults>
</compile_context>

<pallas_src>
import functools

import jax
import jax.numpy as jnp
import numpy as np
from jax import lax
from jax.experimental import pallas as pl
from jax.experimental.pallas import tpu as pltpu


# ----------------------------- Pallas kernel --------------------------------

def _fused_resblock_kernel(x_ref, m0_ref, b0_ref, m1_ref, b1_ref, m2_ref,
                           b2_ref, o_ref, xpad0_ref, xpad1_ref, *,
                           B, H, W, C_IN, C, KH, PAD):
    """conv0(3x3)+ReLU -> [branch] -> conv1(3x3)+ReLU -> Add -> conv2(1x1)+ReLU.

    Lane-dense layout: activations are (B, H, W*C) with W*C on the 128-lane
    axis; the batch tile B is folded into the matmul M dimension (M = B*H).

    x_ref : (B, H, W*C_IN)   bf16 input tile, lane-dense
    m0_ref: (KH, W*C_IN, W*C) bf16 banded conv0 weights (one slab per kh tap)
    m1_ref: (KH, W*C,    W*C) bf16 banded conv1 weights
    m2_ref: (1,  W*C,    W*C) bf16 block-diagonal 1x1 conv2 weights
    b*_ref: (1, W*C)          f32 per-lane (W-tiled) biases
    o_ref : (B, H, W*C)       f32 output tile (full-width lane-dense stores)
    xpad0_ref / xpad1_ref: bf16 VMEM scratch (B, H+2*PAD, W*Cin / W*C); the
    zero border rows provide the spatial H padding (W padding is absorbed
    into the banded weights).
    """
    WCI = W * C_IN
    WC = W * C
    M = B * H

    # Re-zero the pad border rows every step (NOT once under pl.when: with
    # "parallel" semantics the second TensorCore on v7x never runs step 0 and
    # has its own scratch).  Interior rows are overwritten below.
    zpad0 = jnp.zeros((B, PAD, WCI), jnp.bfloat16)
    zpad1 = jnp.zeros((B, PAD, WC), jnp.bfloat16)
    xpad0_ref[:, :PAD, :] = zpad0
    xpad0_ref[:, PAD + H:, :] = zpad0
    xpad1_ref[:, :PAD, :] = zpad1
    xpad1_ref[:, PAD + H:, :] = zpad1

    # ---- conv0: 3x3, pad=1, ReLU  (this is the `branch_to` activation) ------
    xpad0_ref[:, PAD:PAD + H, :] = x_ref[...]
    acc0 = jnp.broadcast_to(b0_ref[...], (M, WC))        # bias folded into init
    for kh in range(KH):                                  # static -> unrolled
        lhs = xpad0_ref[:, kh:kh + H, :].reshape(M, WCI)  # bf16, M = B*H rows
        acc0 = acc0 + jnp.dot(lhs, m0_ref[kh],
                              preferred_element_type=jnp.float32)
    a0 = jnp.maximum(acc0, 0.0)                           # (M, WC) f32

    # ---- conv1: 3x3, pad=1, ReLU --------------------------------------------
    xpad1_ref[:, PAD:PAD + H, :] = a0.reshape(B, H, WC).astype(jnp.bfloat16)
    acc1 = jnp.broadcast_to(b1_ref[...], (M, WC))
    for kh in range(KH):
        lhs = xpad1_ref[:, kh:kh + H, :].reshape(M, WC)
        acc1 = acc1 + jnp.dot(lhs, m1_ref[kh],
                              preferred_element_type=jnp.float32)
    a1 = jnp.maximum(acc1, 0.0)

    # ---- merge (`index`): shapes equal -> Add() -----------------------------
    # Re-load the branch activation from scratch (it is already stored there)
    # instead of keeping a0 live across conv1 -> low vreg pressure at M=B*H.
    branch = xpad1_ref[:, PAD:PAD + H, :].reshape(M, WC).astype(jnp.float32)
    z = a1 + branch

    # ---- conv2: 1x1, pad=0, ReLU (block-diagonal matmul, lane-dense) --------
    acc2 = jnp.dot(z.astype(jnp.bfloat16), m2_ref[0],
                   preferred_element_type=jnp.float32) + b2_ref[...]
    o_ref[...] = jnp.maximum(acc2, 0.0).reshape(B, H, WC).astype(o_ref.dtype)


# ------------------------------ pallas wrapper -------------------------------

def fused_residual_block(x_lane, m0, b0, m1, b1, m2, b2, *,
                         B, H, W, C_IN, C, KH, PAD):
    """x_lane: (N, H, W*C_IN) bf16 lane-dense.  Returns (N, H, W*C) f32."""
    N = x_lane.shape[0]
    Hp = H + 2 * PAD
    WCI, WC = W * C_IN, W * C
    assert N % B == 0, "batch tile must divide N"
    assert WCI % 128 == 0 and WC % 128 == 0, "lane width must be a multiple of 128"
    assert H % 8 == 0, "H must be a multiple of 8 (sublane tiling)"

    kernel = functools.partial(_fused_resblock_kernel, B=B, H=H, W=W,
                               C_IN=C_IN, C=C, KH=KH, PAD=PAD)
    return pl.pallas_call(
        kernel,
        out_shape=jax.ShapeDtypeStruct((N, H, WC), jnp.float32),
        grid_spec=pltpu.PrefetchScalarGridSpec(
            num_scalar_prefetch=0,
            grid=(N // B,),
            in_specs=[
                pl.BlockSpec((B, H, WCI), lambda n: (n, 0, 0)),
                pl.BlockSpec((KH, WCI, WC), lambda n: (0, 0, 0)),   # resident
                pl.BlockSpec((1, WC), lambda n: (0, 0)),
                pl.BlockSpec((KH, WC, WC), lambda n: (0, 0, 0)),
                pl.BlockSpec((1, WC), lambda n: (0, 0)),
                pl.BlockSpec((1, WC, WC), lambda n: (0, 0, 0)),
                pl.BlockSpec((1, WC), lambda n: (0, 0)),
            ],
            out_specs=pl.BlockSpec((B, H, WC), lambda n: (n, 0, 0)),
            scratch_shapes=[
                pltpu.VMEM((B, Hp, WCI), jnp.bfloat16),   # padded conv0 input
                pltpu.VMEM((B, Hp, WC), jnp.bfloat16),    # padded conv1 input
            ],
        ),
        compiler_params=pltpu.CompilerParams(
            dimension_semantics=("parallel",)),           # batch -> 2 TCs on v7x
    )(x_lane, m0, b0, m1, b1, m2, b2)


# ------------------------- one-time parameter prep ---------------------------

def _padded_cin(cin, W):
    """Smallest padded channel count so W*cin_pad is a multiple of 128 lanes."""
    lanes = -(-(W * cin) // 128) * 128
    assert lanes % W == 0, "W must divide the padded lane width"
    return lanes // W


def _banded_conv_weights(w, *, W, pad):
    """w: (KH, KW, Cin, Cout) HWIO -> (KH, W*Cin, W*Cout).

    Row-band matmul form of a stride-1 conv on activations laid out (H, W*C):
        out = sum_kh  xpadH[kh:kh+H, :] @ M[kh]
    W-direction zero padding is absorbed into the band structure of M.
    """
    KH, KW, Cin, Cout = w.shape
    kw_i = np.arange(KW)[:, None, None]
    wi_i = np.arange(W)[None, :, None]
    w_i = np.arange(W)[None, None, :]
    sel = (wi_i == w_i + kw_i - pad).astype(np.float32)     # (KW, W, W)
    m = jnp.einsum("kpw,hkio->hpiwo", jnp.asarray(sel), w)  # (KH, W, Cin, W, Cout)
    return m.reshape(KH, W * Cin, W * Cout)


def prepare_kernel_params(params, *, W):
    """HWIO weights/biases -> banded, lane-dense bf16 kernel operands."""
    cin = params["w0"].shape[2]
    cin_pad = _padded_cin(cin, W)
    # Zero-pad conv0's Cin so W*Cin fills 128 lanes (K=128, unmasked loads).
    w0 = jnp.pad(params["w0"], ((0, 0), (0, 0), (0, cin_pad - cin), (0, 0)))
    c0 = params["w0"].shape[-1]
    c1 = params["w1"].shape[-1]
    c2 = params["w2"].shape[-1]
    return {
        "m0": _banded_conv_weights(w0, W=W, pad=1).astype(jnp.bfloat16),
        "b0": jnp.tile(params["b0"], W).reshape(1, W * c0),            # f32
        "m1": _banded_conv_weights(params["w1"], W=W, pad=1).astype(jnp.bfloat16),
        "b1": jnp.tile(params["b1"], W).reshape(1, W * c1),
        "m2": _banded_conv_weights(params["w2"], W=W, pad=0).astype(jnp.bfloat16),
        "b2": jnp.tile(params["b2"], W).reshape(1, W * c2),
    }


def init_params(key, cin=4, c=8):
    ks = jax.random.split(key, 6)
    scale0 = 1.0 / np.sqrt(cin * 9)
    scale1 = 1.0 / np.sqrt(c * 9)
    scale2 = 1.0 / np.sqrt(c * 1)
    return {
        "w0": jax.random.normal(ks[0], (3, 3, cin, c), jnp.float32) * scale0,
        "b0": jax.random.normal(ks[1], (c,), jnp.float32) * 0.1,
        "w1": jax.random.normal(ks[2], (3, 3, c, c), jnp.float32) * scale1,
        "b1": jax.random.normal(ks[3], (c,), jnp.float32) * 0.1,
        "w2": jax.random.normal(ks[4], (1, 1, c, c), jnp.float32) * scale2,
        "b2": jax.random.normal(ks[5], (c,), jnp.float32) * 0.1,
    }


# --------------------------- network forward pass ----------------------------

def _choose_batch_tile(N, max_b=8):
    """Largest divisor of N <= max_b, preferring >= 2 grid steps (v7x megacore)."""
    divisors = [d for d in range(1, min(max_b, N) + 1) if N % d == 0]
    b = divisors[-1]
    if N // b < 2:
        two_step = [d for d in divisors if N // d >= 2]
        if two_step:
            b = two_step[-1]
    return b


def pytorch_network_forward(x_nchw, kparams, *, C_IN, C, H, W, KH=3, PAD=1):
    """Mirrors PyTorchNetwork.forward for the residual-block instantiation.

    NCHW in / NCHW out (torch semantics). The whole layer graph
    (conv0 -> [branch_to] -> conv1 -> Add merge -> conv2) runs inside ONE
    fused Pallas kernel with all intermediates resident in VMEM.
    """
    # TODO(synk): Bottleneck class (shape-mismatch merge path) is not defined
    # in the provided source; only the equal-shape Add() merge is implemented.
    N = x_nchw.shape[0]
    cin_pad = _padded_cin(C_IN, W)
    # NCHW -> channel-pad -> lane-dense bf16 (N, H, W*cin_pad) boundary ops.
    # TODO(synk): for a production pipeline keep activations lane-dense bf16
    # end-to-end so these boundary transposes leave the hot path entirely.
    xp = jnp.pad(x_nchw, ((0, 0), (0, cin_pad - C_IN), (0, 0), (0, 0)))
    x_lane = jnp.transpose(xp, (0, 2, 3, 1)).reshape(N, H, W * cin_pad)
    x_lane = x_lane.astype(jnp.bfloat16)

    B = _choose_batch_tile(N)
    y_lane = fused_residual_block(
        x_lane, kparams["m0"], kparams["b0"], kparams["m1"], kparams["b1"],
        kparams["m2"], kparams["b2"],
        B=B, H=H, W=W, C_IN=cin_pad, C=C, KH=KH, PAD=PAD)
    # lane-dense (N, H, W*Cout) -> NCHW.
    return jnp.transpose(y_lane.reshape(N, H, W, C), (0, 3, 1, 2))


# ------------------------------ pure-JAX reference ---------------------------

def _ref_conv_relu(x, w, b, padding):
    y = lax.conv_general_dilated(
        x, w, window_strides=(1, 1),
        padding=[(padding, padding), (padding, padding)],
        dimension_numbers=("NHWC", "HWIO", "NHWC"))
    return jnp.maximum(y + b, 0.0)


def _reference_forward(x_nchw, params):
    x = jnp.transpose(x_nchw, (0, 2, 3, 1))
    x = _ref_conv_relu(x, params["w0"], params["b0"], 1)
    branch = x
    x = _ref_conv_relu(x, params["w1"], params["b1"], 1)
    x = x + branch
    x = _ref_conv_relu(x, params["w2"], params["b2"], 0)
    return jnp.transpose(x, (0, 3, 1, 2))


# ----------------------------------- main ------------------------------------

if __name__ == "__main__":
    key = jax.random.PRNGKey(0)
    kx, kp = jax.random.split(key)

    # N=16 so the batched kernel runs B=8 images per grid step (M = 128 matmul
    # rows) over 2 grid steps (both v7x TensorCores busy).
    N, C_IN, H, W, C = 16, 4, 16, 16, 8
    x = jax.random.normal(kx, (N, C_IN, H, W), jnp.float32)   # NCHW like torch
    params = init_params(kp, cin=C_IN, c=C)
    kparams = prepare_kernel_params(params, W=W)               # one-time prep

    fwd = jax.jit(functools.partial(pytorch_network_forward,
                                    C_IN=C_IN, C=C, H=H, W=W))
    out = jax.block_until_ready(fwd(x, kparams))

    ref = jax.block_until_ready(_reference_forward(x, params))
    # Tolerance relaxed from 1e-5: matmul operands (weights + activations) are
    # bf16 in the kernel (f32 accumulation / elementwise), per perf review.
    np.testing.assert_allclose(np.asarray(out), np.asarray(ref),
                               rtol=5e-2, atol=5e-2)
    assert out.shape == (N, C, H, W)

    print("KERNEL_OK")
</pallas_src>

<mosaic_0001>
module attributes {stable_mosaic.version = 11 : i64} {
  func.func @_fused_resblock_kernel(%arg0: i32, %arg1: memref<8x16x128xbf16, #tpu.memory_space<vmem>>, %arg2: memref<3x128x128xbf16, #tpu.memory_space<vmem>>, %arg3: memref<1x128xf32, #tpu.memory_space<vmem>>, %arg4: memref<3x128x128xbf16, #tpu.memory_space<vmem>>, %arg5: memref<1x128xf32, #tpu.memory_space<vmem>>, %arg6: memref<1x128x128xbf16, #tpu.memory_space<vmem>>, %arg7: memref<1x128xf32, #tpu.memory_space<vmem>>, %arg8: memref<8x16x128xf32, #tpu.memory_space<vmem>>, %arg9: memref<8x18x128xbf16, #tpu.memory_space<vmem>>, %arg10: memref<8x18x128xbf16, #tpu.memory_space<vmem>>) attributes {dimension_semantics = [#tpu.dimension_semantics<parallel>], iteration_bounds = array<i64: 2>, scalar_prefetch = 0 : i64, scratch_operands = 2 : i64, tpu.core_type = #tpu.core_type<tc>, window_params = [{transform_indices = @transform_0, window_bounds = array<i64: 8, 16, 128>}, {pipeline_mode = #tpu.pipeline_mode<synchronous>, transform_indices = @transform_1, window_bounds = array<i64: 3, 128, 128>}, {pipeline_mode = #tpu.pipeline_mode<synchronous>, transform_indices = @transform_2, window_bounds = array<i64: 1, 128>}, {pipeline_mode = #tpu.pipeline_mode<synchronous>, transform_indices = @transform_3, window_bounds = array<i64: 3, 128, 128>}, {pipeline_mode = #tpu.pipeline_mode<synchronous>, transform_indices = @transform_4, window_bounds = array<i64: 1, 128>}, {pipeline_mode = #tpu.pipeline_mode<synchronous>, transform_indices = @transform_5, window_bounds = array<i64: 1, 128, 128>}, {pipeline_mode = #tpu.pipeline_mode<synchronous>, transform_indices = @transform_6, window_bounds = array<i64: 1, 128>}, {transform_indices = @transform_7, window_bounds = array<i64: 8, 16, 128>}]} {
    %cst = arith.constant 0.000000e+00 : bf16
    %0 = vector.broadcast %cst : bf16 to vector<8x1x128xbf16>
    %cst_0 = arith.constant 0.000000e+00 : bf16
    %1 = vector.broadcast %cst_0 : bf16 to vector<8x1x128xbf16>
    %c0 = arith.constant 0 : index
    %c0_1 = arith.constant 0 : index
    %c0_2 = arith.constant 0 : index
    %2 = vector.load %arg9[%c0, %c0_1, %c0_2] : memref<8x18x128xbf16, #tpu.memory_space<vmem>>, vector<8x1x128xbf16>
    tpu.vector_store %arg9[%c0, %c0_1, %c0_2], %0 {strides = array<i32>} : memref<8x18x128xbf16, #tpu.memory_space<vmem>>, vector<8x1x128xbf16>,
    %c0_3 = arith.constant 0 : index
    %c17 = arith.constant 17 : index
    %c0_4 = arith.constant 0 : index
    %3 = vector.load %arg9[%c0_3, %c17, %c0_4] : memref<8x18x128xbf16, #tpu.memory_space<vmem>>, vector<8x1x128xbf16>
    tpu.vector_store %arg9[%c0_3, %c17, %c0_4], %0 {strides = array<i32>} : memref<8x18x128xbf16, #tpu.memory_space<vmem>>, vector<8x1x128xbf16>,
    %c0_5 = arith.constant 0 : index
    %c0_6 = arith.constant 0 : index
    %c0_7 = arith.constant 0 : index
    %4 = vector.load %arg10[%c0_5, %c0_6, %c0_7] : memref<8x18x128xbf16, #tpu.memory_space<vmem>>, vector<8x1x128xbf16>
    tpu.vector_store %arg10[%c0_5, %c0_6, %c0_7], %1 {strides = array<i32>} : memref<8x18x128xbf16, #tpu.memory_space<vmem>>, vector<8x1x128xbf16>,
    %c0_8 = arith.constant 0 : index
    %c17_9 = arith.constant 17 : index
    %c0_10 = arith.constant 0 : index
    %5 = vector.load %arg10[%c0_8, %c17_9, %c0_10] : memref<8x18x128xbf16, #tpu.memory_space<vmem>>, vector<8x1x128xbf16>
    tpu.vector_store %arg10[%c0_8, %c17_9, %c0_10], %1 {strides = array<i32>} : memref<8x18x128xbf16, #tpu.memory_space<vmem>>, vector<8x1x128xbf16>,
    %c0_11 = arith.constant 0 : index
    %c0_12 = arith.constant 0 : index
    %c0_13 = arith.constant 0 : index
    %6 = vector.load %arg1[%c0_11, %c0_12, %c0_13] : memref<8x16x128xbf16, #tpu.memory_space<vmem>>, vector<8x16x128xbf16>
    %c0_14 = arith.constant 0 : index
    %c1 = arith.constant 1 : index
    %c0_15 = arith.constant 0 : index
    %7 = vector.load %arg9[%c0_14, %c1, %c0_15] : memref<8x18x128xbf16, #tpu.memory_space<vmem>>, vector<8x16x128xbf16>
    tpu.vector_store %arg9[%c0_14, %c1, %c0_15], %6 {strides = array<i32>} : memref<8x18x128xbf16, #tpu.memory_space<vmem>>, vector<8x16x128xbf16>,
    %c0_16 = arith.constant 0 : index
    %c0_17 = arith.constant 0 : index
    %8 = vector.load %arg3[%c0_16, %c0_17] : memref<1x128xf32, #tpu.memory_space<vmem>>, vector<1x128xf32>
    %9 = vector.shape_cast %8 : vector<1x128xf32> to vector<1x128xf32>
    %10 = vector.broadcast %9 : vector<1x128xf32> to vector<128x128xf32>
    %c0_18 = arith.constant 0 : index
    %c0_19 = arith.constant 0 : index
    %c0_20 = arith.constant 0 : index
    %11 = vector.load %arg9[%c0_18, %c0_19, %c0_20] : memref<8x18x128xbf16, #tpu.memory_space<vmem>>, vector<8x16x128xbf16>
    %12 = vector.shape_cast %11 : vector<8x16x128xbf16> to vector<128x128xbf16>
    %c0_21 = arith.constant 0 : index
    %c0_22 = arith.constant 0 : index
    %c0_23 = arith.constant 0 : index
    %13 = vector.load %arg2[%c0_21, %c0_22, %c0_23] : memref<3x128x128xbf16, #tpu.memory_space<vmem>>, vector<1x128x128xbf16>
    %14 = vector.shape_cast %13 : vector<1x128x128xbf16> to vector<128x128xbf16>
    %cst_24 = arith.constant dense<0.000000e+00> : vector<128x128xf32>
    %15 = tpu.matmul %12, %14, %cst_24 {dimension_numbers = #tpu.dot_dimension_numbers<[1], [0], [0], [1], [0, 0, 1, 1], [], []>} : vector<128x128xbf16>, vector<128x128xbf16>, vector<128x128xf32> -> vector<128x128xf32>
    %16 = arith.addf %10, %15 : vector<128x128xf32>
    %c0_25 = arith.constant 0 : index
    %c1_26 = arith.constant 1 : index
    %c0_27 = arith.constant 0 : index
    %17 = vector.load %arg9[%c0_25, %c1_26, %c0_27] : memref<8x18x128xbf16, #tpu.memory_space<vmem>>, vector<8x16x128xbf16>
    %18 = vector.shape_cast %17 : vector<8x16x128xbf16> to vector<128x128xbf16>
    %c1_28 = arith.constant 1 : index
    %c0_29 = arith.constant 0 : index
    %c0_30 = arith.constant 0 : index
    %19 = vector.load %arg2[%c1_28, %c0_29, %c0_30] : memref<3x128x128xbf16, #tpu.memory_space<vmem>>, vector<1x128x128xbf16>
    %20 = vector.shape_cast %19 : vector<1x128x128xbf16> to vector<128x128xbf16>
    %cst_31 = arith.constant dense<0.000000e+00> : vector<128x128xf32>
    %21 = tpu.matmul %18, %20, %cst_31 {dimension_numbers = #tpu.dot_dimension_numbers<[1], [0], [0], [1], [0, 0, 1, 1], [], []>} : vector<128x128xbf16>, vector<128x128xbf16>, vector<128x128xf32> -> vector<128x128xf32>
    %22 = arith.addf %16, %21 : vector<128x128xf32>
    %c0_32 = arith.constant 0 : index
    %c2 = arith.constant 2 : index
    %c0_33 = arith.constant 0 : index
    %23 = vector.load %arg9[%c0_32, %c2, %c0_33] : memref<8x18x128xbf16, #tpu.memory_space<vmem>>, vector<8x16x128xbf16>
    %24 = vector.shape_cast %23 : vector<8x16x128xbf16> to vector<128x128xbf16>
    %c2_34 = arith.constant 2 : index
    %c0_35 = arith.constant 0 : index
    %c0_36 = arith.constant 0 : index
    %25 = vector.load %arg2[%c2_34, %c0_35, %c0_36] : memref<3x128x128xbf16, #tpu.memory_space<vmem>>, vector<1x128x128xbf16>
    %26 = vector.shape_cast %25 : vector<1x128x128xbf16> to vector<128x128xbf16>
    %cst_37 = arith.constant dense<0.000000e+00> : vector<128x128xf32>
    %27 = tpu.matmul %24, %26, %cst_37 {dimension_numbers = #tpu.dot_dimension_numbers<[1], [0], [0], [1], [0, 0, 1, 1], [], []>} : vector<128x128xbf16>, vector<128x128xbf16>, vector<128x128xf32> -> vector<128x128xf32>
    %28 = arith.addf %22, %27 : vector<128x128xf32>
    %cst_38 = arith.constant 0.000000e+00 : f32
    %29 = vector.broadcast %cst_38 : f32 to vector<128x128xf32>
    %30 = arith.maximumf %28, %29 : vector<128x128xf32>
    %31 = vector.shape_cast %30 : vector<128x128xf32> to vector<8x16x128xf32>
    %32 = arith.truncf %31 : vector<8x16x128xf32> to vector<8x16x128xbf16>
    %c0_39 = arith.constant 0 : index
    %c1_40 = arith.constant 1 : index
    %c0_41 = arith.constant 0 : index
    %33 = vector.load %arg10[%c0_39, %c1_40, %c0_41] : memref<8x18x128xbf16, #tpu.memory_space<vmem>>, vector<8x16x128xbf16>
    tpu.vector_store %arg10[%c0_39, %c1_40, %c0_41], %32 {strides = array<i32>} : memref<8x18x128xbf16, #tpu.memory_space<vmem>>, vector<8x16x128xbf16>,
    %c0_42 = arith.constant 0 : index
    %c0_43 = arith.constant 0 : index
    %34 = vector.load %arg5[%c0_42, %c0_43] : memref<1x128xf32, #tpu.memory_space<vmem>>, vector<1x128xf32>
    %35 = vector.shape_cast %34 : vector<1x128xf32> to vector<1x128xf32>
    %36 = vector.broadcast %35 : vector<1x128xf32> to vector<128x128xf32>
    %c0_44 = arith.constant 0 : index
    %c0_45 = arith.constant 0 : index
    %c0_46 = arith.constant 0 : index
    %37 = vector.load %arg10[%c0_44, %c0_45, %c0_46] : memref<8x18x128xbf16, #tpu.memory_space<vmem>>, vector<8x16x128xbf16>
    %38 = vector.shape_cast %37 : vector<8x16x128xbf16> to vector<128x128xbf16>
    %c0_47 = arith.constant 0 : index
    %c0_48 = arith.constant 0 : index
    %c0_49 = arith.constant 0 : index
    %39 = vector.load %arg4[%c0_47, %c0_48, %c0_49] : memref<3x128x128xbf16, #tpu.memory_space<vmem>>, vector<1x128x128xbf16>
    %40 = vector.shape_cast %39 : vector<1x128x128xbf16> to vector<128x128xbf16>
    %cst_50 = arith.constant dense<0.000000e+00> : vector<128x128xf32>
    %41 = tpu.matmul %38, %40, %cst_50 {dimension_numbers = #tpu.dot_dimension_numbers<[1], [0], [0], [1], [0, 0, 1, 1], [], []>} : vector<128x128xbf16>, vector<128x128xbf16>, vector<128x128xf32> -> vector<128x128xf32>
    %42 = arith.addf %36, %41 : vector<128x128xf32>
    %c0_51 = arith.constant 0 : index
    %c1_52 = arith.constant 1 : index
    %c0_53 = arith.constant 0 : index
    %43 = vector.load %arg10[%c0_51, %c1_52, %c0_53] : memref<8x18x128xbf16, #tpu.memory_space<vmem>>, vector<8x16x128xbf16>
    %44 = vector.shape_cast %43 : vector<8x16x128xbf16> to vector<128x128xbf16>
    %c1_54 = arith.constant 1 : index
    %c0_55 = arith.constant 0 : index
    %c0_56 = arith.constant 0 : index
    %45 = vector.load %arg4[%c1_54, %c0_55, %c0_56] : memref<3x128x128xbf16, #tpu.memory_space<vmem>>, vector<1x128x128xbf16>
    %46 = vector.shape_cast %45 : vector<1x128x128xbf16> to vector<128x128xbf16>
    %cst_57 = arith.constant dense<0.000000e+00> : vector<128x128xf32>
    %47 = tpu.matmul %44, %46, %cst_57 {dimension_numbers = #tpu.dot_dimension_numbers<[1], [0], [0], [1], [0, 0, 1, 1], [], []>} : vector<128x128xbf16>, vector<128x128xbf16>, vector<128x128xf32> -> vector<128x128xf32>
    %48 = arith.addf %42, %47 : vector<128x128xf32>
    %c0_58 = arith.constant 0 : index
    %c2_59 = arith.constant 2 : index
    %c0_60 = arith.constant 0 : index
    %49 = vector.load %arg10[%c0_58, %c2_59, %c0_60] : memref<8x18x128xbf16, #tpu.memory_space<vmem>>, vector<8x16x128xbf16>
    %50 = vector.shape_cast %49 : vector<8x16x128xbf16> to vector<128x128xbf16>
    %c2_61 = arith.constant 2 : index
    %c0_62 = arith.constant 0 : index
    %c0_63 = arith.constant 0 : index
    %51 = vector.load %arg4[%c2_61, %c0_62, %c0_63] : memref<3x128x128xbf16, #tpu.memory_space<vmem>>, vector<1x128x128xbf16>
    %52 = vector.shape_cast %51 : vector<1x128x128xbf16> to vector<128x128xbf16>
    %cst_64 = arith.constant dense<0.000000e+00> : vector<128x128xf32>
    %53 = tpu.matmul %50, %52, %cst_64 {dimension_numbers = #tpu.dot_dimension_numbers<[1], [0], [0], [1], [0, 0, 1, 1], [], []>} : vector<128x128xbf16>, vector<128x128xbf16>, vector<128x128xf32> -> vector<128x128xf32>
    %54 = arith.addf %48, %53 : vector<128x128xf32>
    %cst_65 = arith.constant 0.000000e+00 : f32
    %55 = vector.broadcast %cst_65 : f32 to vector<128x128xf32>
    %56 = arith.maximumf %54, %55 : vector<128x128xf32>
    %c0_66 = arith.constant 0 : index
    %c1_67 = arith.constant 1 : index
    %c0_68 = arith.constant 0 : index
    %57 = vector.load %arg10[%c0_66, %c1_67, %c0_68] : memref<8x18x128xbf16, #tpu.memory_space<vmem>>, vector<8x16x128xbf16>
    %58 = vector.shape_cast %57 : vector<8x16x128xbf16> to vector<128x128xbf16>
    %59 = arith.extf %58 : vector<128x128xbf16> to vector<128x128xf32>
    %60 = arith.addf %56, %59 : vector<128x128xf32>
    %61 = arith.truncf %60 : vector<128x128xf32> to vector<128x128xbf16>
    %c0_69 = arith.constant 0 : index
    %c0_70 = arith.constant 0 : index
    %c0_71 = arith.constant 0 : index
    %62 = vector.load %arg6[%c0_69, %c0_70, %c0_71] : memref<1x128x128xbf16, #tpu.memory_space<vmem>>, vector<1x128x128xbf16>
    %63 = vector.shape_cast %62 : vector<1x128x128xbf16> to vector<128x128xbf16>
    %cst_72 = arith.constant dense<0.000000e+00> : vector<128x128xf32>
    %64 = tpu.matmul %61, %63, %cst_72 {dimension_numbers = #tpu.dot_dimension_numbers<[1], [0], [0], [1], [0, 0, 1, 1], [], []>} : vector<128x128xbf16>, vector<128x128xbf16>, vector<128x128xf32> -> vector<128x128xf32>
    %c0_73 = arith.constant 0 : index
    %c0_74 = arith.constant 0 : index
    %65 = vector.load %arg7[%c0_73, %c0_74] : memref<1x128xf32, #tpu.memory_space<vmem>>, vector<1x128xf32>
    %66 = vector.broadcast %65 : vector<1x128xf32> to vector<128x128xf32>
    %67 = arith.addf %64, %66 : vector<128x128xf32>
    %cst_75 = arith.constant 0.000000e+00 : f32
    %68 = vector.broadcast %cst_75 : f32 to vector<128x128xf32>
    %69 = arith.maximumf %67, %68 : vector<128x128xf32>
    %70 = vector.shape_cast %69 : vector<128x128xf32> to vector<8x16x128xf32>
    %c0_76 = arith.constant 0 : index
    %c0_77 = arith.constant 0 : index
    %c0_78 = arith.constant 0 : index
    %71 = vector.load %arg8[%c0_76, %c0_77, %c0_78] : memref<8x16x128xf32, #tpu.memory_space<vmem>>, vector<8x16x128xf32>
    tpu.vector_store %arg8[%c0_76, %c0_77, %c0_78], %70 {strides = array<i32>} : memref<8x16x128xf32, #tpu.memory_space<vmem>>, vector<8x16x128xf32>,
    return
  }
  func.func @transform_0(%arg0: i32) -> (i32, i32, i32) {
    %c0_i32 = arith.constant 0 : i32
    %c0_i32_0 = arith.constant 0 : i32
    %c0_i32_1 = arith.constant 0 : i32
    return %arg0, %c0_i32, %c0_i32_0 : i32, i32, i32
  }
  func.func @transform_1(%arg0: i32) -> (i32, i32, i32) {
    %c0_i32 = arith.constant 0 : i32
    %c0_i32_0 = arith.constant 0 : i32
    %c0_i32_1 = arith.constant 0 : i32
    %c0_i32_2 = arith.constant 0 : i32
    return %c0_i32, %c0_i32_0, %c0_i32_1 : i32, i32, i32
  }
  func.func @transform_2(%arg0: i32) -> (i32, i32) {
    %c0_i32 = arith.constant 0 : i32
    %c0_i32_0 = arith.constant 0 : i32
    %c0_i32_1 = arith.constant 0 : i32
    return %c0_i32, %c0_i32_0 : i32, i32
  }
  func.func @transform_3(%arg0: i32) -> (i32, i32, i32) {
    %c0_i32 = arith.constant 0 : i32
    %c0_i32_0 = arith.constant 0 : i32
    %c0_i32_1 = arith.constant 0 : i32
    %c0_i32_2 = arith.constant 0 : i32
    return %c0_i32, %c0_i32_0, %c0_i32_1 : i32, i32, i32
  }
  func.func @transform_4(%arg0: i32) -> (i32, i32) {
    %c0_i32 = arith.constant 0 : i32
    %c0_i32_0 = arith.constant 0 : i32
    %c0_i32_1 = arith.constant 0 : i32
    return %c0_i32, %c0_i32_0 : i32, i32
  }
  func.func @transform_5(%arg0: i32) -> (i32, i32, i32) {
    %c0_i32 = arith.constant 0 : i32
    %c0_i32_0 = arith.constant 0 : i32
    %c0_i32_1 = arith.constant 0 : i32
    %c0_i32_2 = arith.constant 0 : i32
    return %c0_i32, %c0_i32_0, %c0_i32_1 : i32, i32, i32
  }
  func.func @transform_6(%arg0: i32) -> (i32, i32) {
    %c0_i32 = arith.constant 0 : i32
    %c0_i32_0 = arith.constant 0 : i32
    %c0_i32_1 = arith.constant 0 : i32
    return %c0_i32, %c0_i32_0 : i32, i32
  }
  func.func @transform_7(%arg0: i32) -> (i32, i32, i32) {
    %c0_i32 = arith.constant 0 : i32
    %c0_i32_0 = arith.constant 0 : i32
    %c0_i32_1 = arith.constant 0 : i32
    return %arg0, %c0_i32, %c0_i32_0 : i32, i32, i32
  }
}

</mosaic_0001>

<bundles_post_ra>
// kernel: pytorch_network_forward.1
= control target key start
LH: loop header
LB: loop body
LE: loop exit
PB: predicated region body
PF: predicated region fallthrough
CT: control target
= control target key end

     0   :  { %s3346_s24 = smov 0   ;;  %s4156_s0 = inlined_call_operand.vmem [shape: bf16[16,16,128], index: 0, kind: input, shape index: {}]   ;;  %s4157_s1 = inlined_call_operand.vmem [shape: bf16[3,128,128], index: 1, kind: input, shape index: {}]   ;;  %s4158_s2 = inlined_call_operand.vmem [shape: f32[1,128], index: 2, kind: input, shape index: {}]   ;;  %s4159_s3 = inlined_call_operand.vmem [shape: bf16[3,128,128], index: 3, kind: input, shape index: {}]   ;;  %s4160_s4 = inlined_call_operand.vmem [shape: f32[1,128], index: 4, kind: input, shape index: {}]   ;;  %s4161_s5 = inlined_call_operand.vmem [shape: bf16[1,128,128], index: 5, kind: input, shape index: {}]   ;;  %s4162_s6 = inlined_call_operand.vmem [shape: f32[1,128], index: 6, kind: input, shape index: {}]   ;;  %s4163_s7 = inlined_call_operand.vmem [shape: f32[16,16,128], index: 7, kind: output, shape index: {}]  }
   0x1 LB: > { %s2808_s25 = sadd.s32 4294967295, %s3304_s24   ;;  %p2812_p0 = scmp.ge.s32.totalorder %s3304_s24, 1  ;;  %s3304_s24 = sphi %s3346_s24, %s17_s24  }
   0x2   : > { %p239_p1 = scmp.lt.s32.totalorder %s3304_s24, 3 }
   0x4   : > { %p240_p2 = pnand %p2812_p0, %p239_p1 }
   0x5   : > { %s2813_s28 = sshll.u32 (!%p240_p2), %s2808_s25, 3 }
   0x6   : > { %243 = sbr.rel (%p240_p2) target bundleno = 678 (0x2a6), region = 48  ;;  %p274_p3 = scmp.lt.s32.totalorder (!%p240_p2), %s2813_s28, 15 }
   0xb   : > { %v3206_v0 = vld [vmem:[%s4157_s1 + $0x38] sm:$0xff]  ;;  %vm288_vm0 = vcmask 1040384   ;;  %vm289_vm1 = vsmask.f32 256  ;;  %v3205_v1 = vld [vmem:[%s4157_s1 + $0x30] sm:$0xff]  ;;  %s4177_s28 = smov (!%p274_p3, %s2813_s28), 15 }
   0xc   : > { %757 = vmatpush.bf16.msra.mxu0 %v3206_v0  ;;  %vm3361_vm2 = vmand %vm288_vm0, %vm289_vm1  ;;  %vm315_vm3 = vsmask.f32 7938  ;;  %3263 = vmatpush.bf16.msra.mxu3 %v3206_v0  ;;  %v291_v3 = vld [vmem:[#allocation2] sm:$0x1]  ;;  %v317_v5 = vld [vmem:[#allocation2 + $0x8] sm:$0x1] }
   0xd   : > { %vm3368_vm4 = vmand %vm288_vm0, %vm315_vm3  ;;  %v292_v6 = vsel %vm3361_vm2, 0, %v291_v3  ;;  %vm405_vm5 = vsmask.f32 4368  ;;  %s3189_s8 = sshll.u32 %s4177_s28, 3  ;;  %v3380_v8 = vld [vmem:[%s4157_s1 + $0x78] sm:$0xff]  ;;  %v3204_v10 = vld [vmem:[%s4157_s1 + $0x28] sm:$0xff] }
   0xe   : > { %v318_v7 = vsel %vm3368_vm4, 0, %v317_v5  ;;  %293 = vst [vmem:[#allocation2] sm:$0x1] %v292_v6  ;;  %v294_v9 = vld [vmem:[#allocation2 + $0xc] sm:$0x1]  ;;  %s3388_s15 = scalar_lea.vmem %s4156_s0, %s3189_s8  ;;  %vm567_vm6 = vcmask 1043456   ;;  %3271 = vmatpush.bf16.msra.mxu1 %v3380_v8  ;;  %vm3407_vm7 = vmor %vm289_vm1, %vm405_vm5 }
   0xf   : > { %319 = vst [vmem:[#allocation2 + $0x8] sm:$0x1] %v318_v7  ;;  %v295_v11 = vsel %vm3361_vm2, 0, %v294_v9  ;;  %v389_v12 = vld [vmem:[%s3388_s15] sm:$0xf]  ;;  %v3397_v14 = vld [vmem:[%s4157_s1 + $0x70] sm:$0xff]  ;;  %vm3413_vm8 = vmand %vm567_vm6, %vm315_vm3 }
  0x10   : > { %758 = vmatpush.bf16.msra.mxu0 %v3205_v1  ;;  %3264 = vmatpush.bf16.msra.mxu3 %v3205_v1  ;;  %v390_v13 = vld [vmem:[%s3388_s15 + $0x4] sm:$0xf]  ;;  %v408_v15 = vshrl.u32 %v389_v12, 16  ;;  %v411_v16 = vshll.u32 %v389_v12, 16  ;;  %296 = vst [vmem:[#allocation2 + $0xc] sm:$0x1] %v295_v11 }
  0x11   : > { %v416_v17 = vshrl.u32 %v390_v13, 16  ;;  %v419_v18 = vshll.u32 %v390_v13, 16  ;;  %v391_v19 = vld [vmem:[%s3388_s15 + $0x8] sm:$0xf]  ;;  %v392_v20 = vld [vmem:[%s3388_s15 + $0xc] sm:$0xf] }
  0x12   : > { %v3203_v21 = vld [vmem:[%s4157_s1 + $0x20] sm:$0xff]  ;;  %v410_v23 = vrot.slane %v408_v15, 7  ;;  %v425_v25 = vshrl.u32 %v391_v19, 16  ;;  %v428_v27 = vshll.u32 %v391_v19, 16  ;;  %v433_v28 = vshrl.u32 %v392_v20, 16  ;;  %3272 = vmatpush.bf16.msra.mxu1 %v3397_v14  ;;  %v3212_v36 = vld [vmem:[%s4157_s1 + $0x68] sm:$0xff] }
  0x13   : > { %v418_v24 = vrot.slane %v416_v17, 7  ;;  %v436_v29 = vshll.u32 %v392_v20, 16  ;;  %v3202_v39 = vld [vmem:[%s4157_s1 + $0x18] sm:$0xff]  ;;  %v3211_v47 = vld [vmem:[%s4157_s1 + $0x60] sm:$0xff]  ;;  %v3201_v50 = vld [vmem:[%s4157_s1 + $0x10] sm:$0xff]  ;;  %vm1235_vm12 = vcmask 1042432  }
  0x14   : > { %759 = vmatpush.bf16.msra.mxu0 %v3204_v10  ;;  %3265 = vmatpush.bf16.msra.mxu3 %v3204_v10  ;;  %v413_v30 = vor.u32 %v411_v16, %v410_v23  ;;  %v414_v31 = vrot.slane %v410_v23, 4  ;;  %v427_v37 = vrot.slane %v425_v25, 7  ;;  %v435_v38 = vrot.slane %v433_v28, 7  ;;  %v3210_v51 = vld [vmem:[%s4157_s1 + $0x58] sm:$0xff]  ;;  %v320_v52 = vld [vmem:[#allocation2 + $0x14] sm:$0x1] }
  0x15   : > { %v421_v32 = vor.u32 %v419_v18, %v418_v24  ;;  %v423_v33 = vrot.slane %v418_v24, 4  ;;  %v569_v34 = vld [vmem:[#allocation2] sm:$0xf]  ;;  %v3200_v53 = vld [vmem:[%s4157_s1 + $0x8] sm:$0xff]  ;;  %v321_v54 = vsel %vm3368_vm4, 0, %v320_v52  ;;  %v3451_v55 = vld [vmem:[%s4157_s1 + $0x50] sm:$0xff] }
  0x16   : > { %v573_v35 = vld [vmem:[#allocation2 + $0x8] sm:$0x1]  ;;  %v570_v41 = vsel %vm3413_vm8, %v413_v30, %v569_v34  ;;  %v430_v43 = vor.u32 %v428_v27, %v427_v37  ;;  %v431_v44 = vrot.slane %v427_v37, 4  ;;  %v438_v45 = vor.u32 %v436_v29, %v435_v38  ;;  %3273 = vmatpush.bf16.msra.mxu1 %v3212_v36  ;;  %322 = vst [vmem:[#allocation2 + $0x14] sm:$0x1] %v321_v54  ;;  %v3199_v56 = vld [vmem:[%s4157_s1] sm:$0xff] }
  0x17   : > { %v422_v40 = vsel %vm3407_vm7, %v414_v31, %v421_v32  ;;  %v574_v42 = vsel %vm3361_vm2, %v423_v33, %v573_v35  ;;  %571 = vst [vmem:[#allocation2] sm:$0xf] %v570_v41  ;;  %v576_v46 = vld [vmem:[#allocation2 + $0xc] sm:$0xf]  ;;  %v440_v57 = vrot.slane %v435_v38, 4  ;;  %v3467_v61 = vld [vmem:[%s4157_s1 + $0xb8] sm:$0xff] }
  0x18   : > { %760 = vmatpush.bf16.msra.mxu0 %v3203_v21  ;;  %3266 = vmatpush.bf16.msra.mxu3 %v3203_v21  ;;  %572 = vst [vmem:[#allocation2 + $0x4] sm:$0xf] %v422_v40  ;;  %v439_v48 = vsel %vm3407_vm7, %v431_v44, %v438_v45  ;;  %v577_v49 = vsel %vm3413_vm8, %v430_v43, %v576_v46  ;;  %v3460_v59 = vld [vmem:[%s4157_s1 + $0x48] sm:$0xff]  ;;  %v3474_v63 = vld [vmem:[%s4157_s1 + $0x40] sm:$0xff]  ;;  %v3484_v3 = vld [vmem:[%s4157_s1 + $0xb0] sm:$0xff]  ;;  %vm1236_vm13 = vcmask 1046532  }
  0x19   : > { %575 = vst [vmem:[#allocation2 + $0x8] sm:$0x1] %v574_v42  ;;  %3279 = vmatpush.bf16.msra.mxu2 %v3467_v61  ;;  %v3492_v9 = vld [vmem:[%s4157_s1 + $0xa8] sm:$0xff]  ;;  %v3500_v16 = vld [vmem:[%s4157_s1 + $0xa0] sm:$0xff]  ;;  %vm846_vm9 = vsmask.f32 3328  ;;  %vm3573_vm14 = vmor %vm1235_vm12, %vm1236_vm13 }
  0x1a   : > { %578 = vst [vmem:[#allocation2 + $0xc] sm:$0xf] %v577_v49  ;;  %3274 = vmatpush.bf16.msra.mxu1 %v3211_v47  ;;  %vm847_vm10 = vsmask.f32 7440  ;;  %v3511_v28 = vld [vmem:[%s4157_s1 + $0x98] sm:$0xff]  ;;  %v3524_v40 = vld [vmem:[%s4157_s1 + $0x90] sm:$0xff] }
  0x1b   : > { %579 = vst [vmem:[#allocation2 + $0x10] sm:$0xf] %v439_v48  ;;  %v297_v32 = vld [vmem:[#allocation2 + $0x18] sm:$0x1]  ;;  %vm3513_vm11 = vmor %vm846_vm9, %vm847_vm10  ;;  %v393_v41 = vld [vmem:[%s3388_s15 + $0x10] sm:$0xf] }
  0x1c   : > { %761 = vmatpush.bf16.msra.mxu0 %v3202_v39  ;;  %3267 = vmatpush.bf16.msra.mxu3 %v3202_v39  ;;  %v323_v39 = vld [vmem:[#allocation2 + $0x20] sm:$0x1]  ;;  %v394_v42 = vld [vmem:[%s3388_s15 + $0x14] sm:$0xf]  ;;  %v442_v46 = vshrl.u32 %v393_v41, 16  ;;  %s3190_s22 = sshll.u32 %s4177_s28, 4 }
  0x1d   : > { %v580_v60 = vld [vmem:[#allocation2 + $0x14] sm:$0x1]  ;;  %3280 = vmatpush.bf16.msra.mxu2 %v3484_v3  ;;  %v324_v43 = vsel %vm3368_vm4, 0, %v323_v39  ;;  %v453_v52 = vshll.u32 %v394_v42, 16  ;;  %s4120_s26 = scalar_lea.vmem %s4163_s7, %s3190_s22 }
  0x1e   : > { %3275 = vmatpush.bf16.msra.mxu1 %v3210_v51  ;;  %v581_v62 = vsel %vm3361_vm2, %v440_v57, %v580_v60  ;;  %v822_v0 = vld [vmem:[#allocation2] sm:$0xf]  ;;  %325 = vst [vmem:[#allocation2 + $0x20] sm:$0x1] %v324_v43  ;;  %v444_v49 = vrot.slane %v442_v46, 7  ;;  %v3541_v57 = vld [vmem:[%s4157_s1 + $0x88] sm:$0xff] }
  0x1f   : > { %v3191_v58 = vld [vmem:[#allocation2] sm:$0xff]  ;;  %582 = vst [vmem:[#allocation2 + $0x14] sm:$0x1] %v581_v62  ;;  %v850_v5 = vshrl.u32 %v822_v0, 16  ;;  %v853_v6 = vshll.u32 %v822_v0, 16 }
  0x20   : > { %762 = vmatpush.bf16.msra.mxu0 %v3201_v50  ;;  %3268 = vmatpush.bf16.msra.mxu3 %v3201_v50  ;;  %v3476_v1 = vld [vmem:[#allocation2 + $0x4] sm:$0xf]  ;;  %v445_v50 = vshll.u32 %v393_v41, 16  ;;  %v448_v62 = vrot.slane %v444_v49, 4  ;;  %v395_v46 = vld [vmem:[%s3388_s15 + $0x18] sm:$0xf] }
  0x21   : > { %v859_v7 = vshll.u32 %v3476_v1, 16  ;;  %v852_v10 = vrot.slane %v850_v5, 4  ;;  %v855_v11 = vrot.slane %v853_v6, 5  ;;  %3281 = vmatpush.bf16.msra.mxu2 %v3492_v9  ;;  %v825_v15 = vld [vmem:[#allocation2 + $0xc] sm:$0xf] }
  0x22   : > { %3276 = vmatpush.bf16.msra.mxu1 %v3451_v55  ;;  %v3502_v17 = vld [vmem:[#allocation2 + $0x10] sm:$0xf]  ;;  %v874_v23 = vshrl.u32 %v825_v15, 16  ;;  %v877_v24 = vshll.u32 %v825_v15, 16  ;;  %v447_v60 = vor.u32 %v445_v50, %v444_v49 }
  0x23   : > { %v861_v12 = vrot.slane %v859_v7, 5  ;;  %v3192_v18 = vld [vmem:[#allocation2 + $0xc] sm:$0xff]  ;;  %v856_v19 = vor.u32 %v855_v11, %v852_v10  ;;  %v883_v25 = vshll.u32 %v3502_v17, 16  ;;  %v887_v27 = vshrl.u32 %v3502_v17, 16  ;;  %v3554_v10 = vld [vmem:[%s4157_s1 + $0x80] sm:$0xff] }
  0x24   : > { %763 = vmatpush.bf16.msra.mxu0 %v3200_v53  ;;  %3269 = vmatpush.bf16.msra.mxu3 %v3200_v53  ;;  %v876_v34 = vrot.slane %v874_v23, 4  ;;  %v879_v35 = vrot.slane %v877_v24, 5 }
  0x25   : > { %3282 = vmatpush.bf16.msra.mxu2 %v3500_v16  ;;  %v857_v29 = vrot.slane %v856_v19, 4  ;;  %v885_v37 = vrot.slane %v883_v25, 5  ;;  %v889_v38 = vrot.slane %v887_v27, 4  ;;  %v587_v11 = vld [vmem:[#allocation2 + $0x20] sm:$0x1] }
  0x26   : > { %3277 = vmatpush.bf16.msra.mxu1 %v3460_v59  ;;  %v3534_v48 = vld [vmem:[#allocation2 + $0x14] sm:$0x1]  ;;  %v300_v19 = vld [vmem:[#allocation2 + $0x24] sm:$0x1] }
  0x27   : > { %v862_v44 = vsel %vm3513_vm11, %v857_v29, %v861_v12  ;;  %v301_v24 = vsel %vm3361_vm2, 0, %v300_v19 }
  0x28   : > { %764 = vmatpush.bf16.msra.mxu0 %v3199_v56  ;;  %3270 = vmatpush.bf16.msra.mxu3 %v3199_v56  ;;  %v1058_v53 = vunpack.c.l.b16 %v862_v44  ;;  %v890_v56 = vor.u32 %v889_v38, %v885_v37  ;;  %302 = vst [vmem:[#allocation2 + $0x24] sm:$0x1] %v301_v24 }
  0x29   : > { %3283 = vmatpush.bf16.msra.mxu2 %v3511_v28 }
  0x2a   : > { %3278 = vmatpush.bf16.msra.mxu1 %v3474_v63 }
  0x2b   : > { %765 = vmatmul.bf16.vlgmr.msra.gmra.mxu0 %v3191_v58  ;;  %v893_v58 = vshll.u32 %v3534_v48, 16 }
  0x2c   : > { %1138 = vmatpush.bf16.msrb.mxu0 %v3380_v8  ;;  %v863_v8 = vshrl.u32 %v3476_v1, 16 }
  0x2d   : > { %3284 = vmatpush.bf16.msra.mxu2 %v3524_v40 }
  0x2e   : > { %v865_v13 = vrot.slane %v863_v8, 4 }
  0x30   : > { %1139 = vmatpush.bf16.msrb.mxu0 %v3397_v14  ;;  %v3494_v14 = vld [vmem:[#allocation2 + $0x8] sm:$0x1]  ;;  %v866_v20 = vor.u32 %v865_v13, %v861_v12  ;;  %v891_v13 = vrot.slane %v890_v56, 4  ;;  %v326_v56 = vld [vmem:[#allocation2 + $0x2c] sm:$0x1] }
  0x31   : > { %v869_v21 = vshll.u32 %v3494_v14, 16  ;;  %3285 = vmatpush.bf16.msra.mxu2 %v3541_v57 }
  0x32   : > { %v867_v30 = vrot.slane %v866_v20, 4 }
  0x33   : > { %v871_v31 = vrot.slane %v869_v21, 5 }
  0x34   : > { %1140 = vmatpush.bf16.msrb.mxu0 %v3212_v36  ;;  %v298_v36 = vsel %vm3361_vm2, 0, %v297_v32 }
  0x35   : > { %299 = vst [vmem:[#allocation2 + $0x18] sm:$0x1] %v298_v36  ;;  %v872_v45 = vsel %vm3513_vm11, %v867_v30, %v871_v31  ;;  %3286 = vmatpush.bf16.msra.mxu2 %v3554_v10 }
  0x36   : > { %v1059_v54 = vunpack.c.l.b16 %v872_v45 }
  0x38   : > { %1141 = vmatpush.bf16.msrb.mxu0 %v3211_v47  ;;  %v450_v47 = vshrl.u32 %v394_v42, 16  ;;  %v1074_v12 = vpack.c.b16 %v1059_v54, %v1058_v53 }
  0x3b   : > { %770 = vmatmul.bf16.gmra.mxu0 %v3192_v18 }
  0x3c   : > { %1142 = vmatpush.bf16.msrb.mxu0 %v3210_v51  ;;  %v452_v51 = vrot.slane %v450_v47, 7 }
  0x3e   : > { %v455_v0 = vor.u32 %v453_v52, %v452_v51  ;;  %v457_v6 = vrot.slane %v452_v51, 4  ;;  %v396_v51 = vld [vmem:[%s3388_s15 + $0x1c] sm:$0xf] }
  0x40   : > { %1143 = vmatpush.bf16.msrb.mxu0 %v3451_v55  ;;  %v880_v55 = vor.u32 %v879_v35, %v876_v34  ;;  %v456_v5 = vsel %vm3407_vm7, %v448_v62, %v455_v0  ;;  %v588_v15 = vsel %vm3361_vm2, %v457_v6, %v587_v11  ;;  %v462_v62 = vshll.u32 %v395_v46, 16 }
  0x41   : > { %586 = vst [vmem:[#allocation2 + $0x1c] sm:$0xf] %v456_v5  ;;  %v467_v0 = vshrl.u32 %v396_v51, 16 }
  0x42   : > { %v881_v8 = vrot.slane %v880_v55, 4  ;;  %589 = vst [vmem:[#allocation2 + $0x20] sm:$0x1] %v588_v15  ;;  %v459_v55 = vshrl.u32 %v395_v46, 16 }
  0x44   : > { %1144 = vmatpush.bf16.msrb.mxu0 %v3460_v59  ;;  %v583_v59 = vld [vmem:[#allocation2 + $0x18] sm:$0xf]  ;;  %v461_v6 = vrot.slane %v459_v55, 7 }
  0x45   : > { %v584_v7 = vsel %vm3413_vm8, %v447_v60, %v583_v59  ;;  %v1203_v59 = vld [vmem:[#allocation2] sm:$0xe] }
  0x46   : > { %585 = vst [vmem:[#allocation2 + $0x18] sm:$0xf] %v584_v7  ;;  %v470_v7 = vshll.u32 %v396_v51, 16  ;;  %v2931_v19 = vrot.slane %v1203_v59, 9 }
  0x48   : > { %1145 = vmatpush.bf16.msrb.mxu0 %v3474_v63  ;;  %v895_v63 = vrot.slane %v893_v58, 5  ;;  %v829_v27 = vld [vmem:[#allocation2 + $0x1c] sm:$0xf] }
  0x49   : > { %v830_v32 = vld [vmem:[#allocation2 + $0x20] sm:$0x1]  ;;  %v1254_v34 = vrot.slane %v829_v27, 5  ;;  %v907_v35 = vshll.u32 %v829_v27, 16  ;;  %v911_v36 = vshrl.u32 %v829_v27, 16 }
  0x4a   : > { %v896_v18 = vsel %vm3513_vm11, %v891_v13, %v895_v63  ;;  %v917_v41 = vshll.u32 %v830_v32, 16  ;;  %v327_v13 = vsel %vm3368_vm4, 0, %v326_v56 }
  0x4b   : > { %1146 = vmatmul.bf16.vlgmr.msrb.gmra.mxu0 %v1074_v12  ;;  %v1256_v43 = vrot.slane %v1254_v34, 4  ;;  %v909_v44 = vrot.slane %v907_v35, 5  ;;  %v913_v45 = vrot.slane %v911_v36, 4  ;;  %v469_v12 = vrot.slane %v467_v0, 7  ;;  %328 = vst [vmem:[#allocation2 + $0x2c] sm:$0x1] %v327_v13 }
  0x4c   : > { %1391 = vmatpush.bf16.msra.mxu0 %v3467_v61  ;;  %v886_v61 = vsel %vm3513_vm11, %v881_v8, %v885_v37  ;;  %v919_v54 = vrot.slane %v917_v41, 5 }
  0x4d   : > { %v3564_v20 = vunpack.c.l.b16 %v886_v61  ;;  %v1205_v21 = vld [vmem:[#allocation2 + $0x18] sm:$0xe]  ;;  %v914_v53 = vor.u32 %v913_v45, %v909_v44  ;;  %v464_v61 = vor.u32 %v462_v62, %v461_v6  ;;  %v474_v27 = vrot.slane %v469_v12, 4 }
  0x4e   : > { %v828_v23 = vld [vmem:[#allocation2 + $0x18] sm:$0xf]  ;;  %v2933_v29 = vrot.slane %v1205_v21, 9  ;;  %v1243_v21 = vrot.slane %v3494_v14, 5 }
  0x4f   : > { %v3193_v25 = vld [vmem:[#allocation2 + $0x18] sm:$0xff]  ;;  %v898_v30 = vshrl.u32 %v828_v23, 16  ;;  %v901_v31 = vshll.u32 %v828_v23, 16  ;;  %v915_v5 = vrot.slane %v914_v53, 4 }
  0x50   : > { %1392 = vmatpush.bf16.msra.mxu0 %v3484_v3  ;;  %v3569_v3 = vunpack.c.l.b16 %v896_v18  ;;  %775 = vmatmul.bf16.vlgmr.msra.gmra.mxu3 %v3193_v25  ;;  %v1255_v42 = vsel %vm3573_vm14, %v2933_v29, %v1254_v34  ;;  %v465_v18 = vrot.slane %v461_v6, 4  ;;  %v303_v29 = vld [vmem:[#allocation2 + $0x30] sm:$0x1] }
  0x51   : > { %v900_v38 = vrot.slane %v898_v30, 4  ;;  %v903_v39 = vrot.slane %v901_v31, 5  ;;  %v1315_v49 = vunpack.c.l.b16 %v1255_v42  ;;  %v920_v63 = vsel %vm3513_vm11, %v915_v5, %v919_v54  ;;  %v397_v30 = vld [vmem:[%s3388_s15 + $0x20] sm:$0xf]  ;;  %v3603_v31 = vld [vmem:[#allocation2 + $0xc] sm:$0xe] }
  0x52   : > { %v1075_v47 = vpack.c.b16 %v3569_v3, %v3564_v20  ;;  %v472_v20 = vor.u32 %v470_v7, %v469_v12  ;;  %v476_v34 = vshrl.u32 %v397_v30, 16  ;;  %v479_v42 = vshll.u32 %v397_v30, 16 }
  0x53   : > { %v904_v50 = vor.u32 %v903_v39, %v900_v38  ;;  %v329_v38 = vld [vmem:[#allocation2 + $0x38] sm:$0x1]  ;;  %v594_v39 = vld [vmem:[#allocation2 + $0x2c] sm:$0x1] }
  0x54   : > { %1393 = vmatpush.bf16.msra.mxu0 %v3492_v9  ;;  %v1257_v9 = vrot.slane %v830_v32, 5  ;;  %v473_v25 = vsel %vm3407_vm7, %v465_v18, %v472_v20  ;;  %v304_v32 = vsel %vm3361_vm2, 0, %v303_v29  ;;  %v478_v41 = vrot.slane %v476_v34, 7 }
  0x55   : > { %v905_v60 = vrot.slane %v904_v50, 4  ;;  %593 = vst [vmem:[#allocation2 + $0x28] sm:$0xf] %v473_v25  ;;  %v595_v45 = vsel %vm3361_vm2, %v474_v27, %v594_v39  ;;  %v1250_v50 = vrot.slane %v3534_v48, 5 }
  0x56   : > { %v1258_v52 = vsel %vm3573_vm14, %v1256_v43, %v1257_v9  ;;  %305 = vst [vmem:[#allocation2 + $0x30] sm:$0x1] %v304_v32  ;;  %v330_v43 = vsel %vm3368_vm4, 0, %v329_v38  ;;  %v482_v51 = vrot.slane %v478_v41, 4  ;;  %v481_v59 = vor.u32 %v479_v42, %v478_v41 }
  0x57   : > { %v1316_v58 = vunpack.c.l.b16 %v1258_v52  ;;  %v910_v11 = vsel %vm3513_vm11, %v905_v60, %v909_v44  ;;  %331 = vst [vmem:[#allocation2 + $0x38] sm:$0x1] %v330_v43 }
  0x58   : > { %1394 = vmatpush.bf16.msra.mxu0 %v3500_v16  ;;  %v1240_v16 = vrot.slane %v3476_v1, 5  ;;  %v1062_v15 = vunpack.c.l.b16 %v910_v11  ;;  %v590_v1 = vld [vmem:[#allocation2 + $0x24] sm:$0xf]  ;;  %596 = vst [vmem:[#allocation2 + $0x2c] sm:$0x1] %v595_v45 }
  0x59   : > { %v1329_v8 = vpack.c.b16 %v1316_v58, %v1315_v49  ;;  %v591_v24 = vsel %vm3413_vm8, %v464_v61, %v590_v1  ;;  %v1247_v49 = vrot.slane %v3502_v17, 5  ;;  %v399_v1 = vld [vmem:[%s3388_s15 + $0x28] sm:$0xf] }
  0x5a   : > { %v1242_v23 = vrot.slane %v1240_v16, 4  ;;  %592 = vst [vmem:[#allocation2 + $0x24] sm:$0xf] %v591_v24  ;;  %v1241_v14 = vsel %vm3573_vm14, %v2931_v19, %v1240_v16  ;;  %v400_v24 = vld [vmem:[%s3388_s15 + $0x2c] sm:$0xf]  ;;  %v493_v30 = vshrl.u32 %v399_v1, 16 }
  0x5b   : > { %1409 = vmatmul.bf16.vlgmr.msra.gmra.mxu2 %v1329_v8  ;;  %1151 = vmatmul.bf16.gmra.mxu0 %v1075_v47  ;;  %v1311_v44 = vunpack.c.l.b16 %v1241_v14  ;;  %v306_v8 = vld [vmem:[#allocation2 + $0x3c] sm:$0x1]  ;;  %v501_v34 = vshrl.u32 %v400_v24, 16  ;;  %v504_v38 = vshll.u32 %v400_v24, 16 }
  0x5c   : > { %1395 = vmatpush.bf16.msra.mxu0 %v3511_v28  ;;  %v1063_v28 = vunpack.c.l.b16 %v920_v63  ;;  %v1244_v35 = vsel %vm3573_vm14, %v1242_v23, %v1243_v21  ;;  %v832_v58 = vld [vmem:[#allocation2 + $0x28] sm:$0xf]  ;;  %v1249_v63 = vrot.slane %v1247_v49, 4  ;;  %v307_v23 = vsel %vm3361_vm2, 0, %v306_v8 }
  0x5d   : > { %v1312_v47 = vunpack.c.l.b16 %v1244_v35  ;;  %v1261_v16 = vrot.slane %v832_v58, 5  ;;  %v931_v5 = vshll.u32 %v832_v58, 16  ;;  %v935_v6 = vshrl.u32 %v832_v58, 16  ;;  %308 = vst [vmem:[#allocation2 + $0x3c] sm:$0x1] %v307_v23 }
  0x5e   : > { %v1076_v3 = vpack.c.b16 %v1063_v28, %v1062_v15  ;;  %v601_v21 = vld [vmem:[#allocation2 + $0x38] sm:$0x1]  ;;  %v3637_v43 = vrot.slane %v501_v34, 7 }
  0x5f   : > { %v1327_v11 = vpack.c.b16 %v1312_v47, %v1311_v44  ;;  %v933_v61 = vrot.slane %v931_v5, 5  ;;  %v937_v18 = vrot.slane %v935_v6, 4  ;;  %v1263_v19 = vrot.slane %v1261_v16, 4  ;;  %v332_v6 = vld [vmem:[#allocation2 + $0x44] sm:$0x1] }
  0x60   : > { %1396 = vmatpush.bf16.msra.mxu0 %v3524_v40  ;;  %1156 = vmatmul.bf16.vlgmr.msra.gmra.mxu1 %v1076_v3  ;;  %v398_v40 = vld [vmem:[%s3388_s15 + $0x24] sm:$0xf]  ;;  %v833_v3 = vld [vmem:[#allocation2 + $0x2c] sm:$0x1]  ;;  %v506_v58 = vor.u32 %v504_v38, %v3637_v43 }
  0x61   : > { %v484_v36 = vshrl.u32 %v398_v40, 16  ;;  %v487_v9 = vshll.u32 %v398_v40, 16  ;;  %v1206_v52 = vld [vmem:[#allocation2 + $0x24] sm:$0xe]  ;;  %v938_v27 = vor.u32 %v937_v18, %v933_v61  ;;  %v1264_v14 = vrot.slane %v833_v3, 5 }
  0x62   : > { %v831_v53 = vld [vmem:[#allocation2 + $0x24] sm:$0xf]  ;;  %v2934_v60 = vrot.slane %v1206_v52, 9  ;;  %v941_v40 = vshll.u32 %v833_v3, 16 }
  0x63   : > { %v486_v46 = vrot.slane %v484_v36, 7  ;;  %v3194_v56 = vld [vmem:[#allocation2 + $0x24] sm:$0xff]  ;;  %v922_v62 = vshrl.u32 %v831_v53, 16  ;;  %v925_v0 = vshll.u32 %v831_v53, 16  ;;  %v939_v35 = vrot.slane %v938_v27, 4 }
  0x64   : > { %1397 = vmatpush.bf16.msra.mxu0 %v3541_v57  ;;  %v2932_v57 = vrot.slane %v3603_v31, 9  ;;  %780 = vmatmul.bf16.gmra.mxu3 %v3194_v56  ;;  %v1262_v15 = vsel %vm3573_vm14, %v2934_v60, %v1261_v16  ;;  %v495_v36 = vrot.slane %v493_v30, 7  ;;  %v1265_v39 = vsel %vm3573_vm14, %v1263_v19, %v1264_v14  ;;  %v604_v48 = vld [vmem:[#allocation2 + $0x3c] sm:$0xf] }
  0x65   : > { %v489_v54 = vor.u32 %v487_v9, %v486_v46  ;;  %v491_v55 = vrot.slane %v486_v46, 4  ;;  %v924_v12 = vrot.slane %v922_v62, 4  ;;  %v927_v13 = vrot.slane %v925_v0, 5 }
  0x66   : > { %v1317_v25 = vunpack.c.l.b16 %v1262_v15  ;;  %v496_v9 = vshll.u32 %v399_v1, 16  ;;  %v943_v42 = vrot.slane %v941_v40, 5  ;;  %v1318_v44 = vunpack.c.l.b16 %v1265_v39  ;;  %v309_v39 = vld [vmem:[#allocation2 + $0x48] sm:$0x1] }
  0x67   : > { %v490_v7 = vsel %vm3407_vm7, %v482_v51, %v489_v54  ;;  %v928_v28 = vor.u32 %v927_v13, %v924_v12  ;;  %v602_v29 = vsel %vm3361_vm2, %v491_v55, %v601_v21  ;;  %v499_v56 = vrot.slane %v495_v36, 4 }
  0x68   : > { %1398 = vmatpush.bf16.msra.mxu0 %v3554_v10  ;;  %v597_v10 = vld [vmem:[#allocation2 + $0x30] sm:$0xf]  ;;  %600 = vst [vmem:[#allocation2 + $0x34] sm:$0xf] %v490_v7  ;;  %v944_v47 = vsel %vm3513_vm11, %v939_v35, %v943_v42  ;;  %v1330_v54 = vpack.c.b16 %v1318_v44, %v1317_v25  ;;  %v1248_v60 = vsel %vm3573_vm14, %v2932_v57, %v1247_v49  ;;  %v333_v21 = vsel %vm3368_vm4, 0, %v332_v6 }
  0x69   : > { %v598_v20 = vsel %vm3413_vm8, %v481_v59, %v597_v10  ;;  %v929_v32 = vrot.slane %v928_v28, 4  ;;  %603 = vst [vmem:[#allocation2 + $0x38] sm:$0x1] %v602_v29  ;;  %v1065_v55 = vunpack.c.l.b16 %v944_v47  ;;  %v1251_v62 = vsel %vm3573_vm14, %v1249_v63, %v1250_v50 }
  0x6a   : > { %599 = vst [vmem:[#allocation2 + $0x30] sm:$0xf] %v598_v20  ;;  %v498_v5 = vor.u32 %v496_v9, %v495_v36  ;;  %v507_v63 = vsel %vm3407_vm7, %v499_v56, %v506_v58  ;;  %v1314_v19 = vunpack.c.l.b16 %v1251_v62  ;;  %v508_v35 = vrot.slane %v3637_v43, 4  ;;  %v401_v58 = vld [vmem:[%s3388_s15 + $0x30] sm:$0xf] }
  0x6b   : > { %v934_v41 = vsel %vm3513_vm11, %v929_v32, %v933_v61  ;;  %1399 = vmatmul.bf16.vlgmr.msra.gmra.mxu0 %v1327_v11  ;;  %1414 = vmatmul.bf16.gmra.mxu2 %v1330_v54  ;;  %v1313_v61 = vunpack.c.l.b16 %v1248_v60  ;;  %607 = vst [vmem:[#allocation2 + $0x40] sm:$0xf] %v507_v63  ;;  %v310_v44 = vsel %vm3361_vm2, 0, %v309_v39  ;;  %v402_v60 = vld [vmem:[%s3388_s15 + $0x34] sm:$0xf] }
  0x6c   : > { %v1064_v45 = vunpack.c.l.b16 %v934_v41  ;;  %v605_v20 = vsel %vm3413_vm8, %v498_v5, %v604_v48  ;;  %334 = vst [vmem:[#allocation2 + $0x44] sm:$0x1] %v333_v21  ;;  %v510_v5 = vshrl.u32 %v401_v58, 16 }
  0x6d   : > { %606 = vst [vmem:[#allocation2 + $0x3c] sm:$0xf] %v605_v20  ;;  %v1328_v29 = vpack.c.b16 %v1314_v19, %v1313_v61 }
  0x6e   : > { %v1077_v7 = vpack.c.b16 %v1065_v55, %v1064_v45  ;;  %311 = vst [vmem:[#allocation2 + $0x48] sm:$0x1] %v310_v44 }
  0x6f   : > { %v835_v46 = vld [vmem:[#allocation2 + $0x34] sm:$0xf] }
  0x70   : > { %v1268_v51 = vrot.slane %v835_v46, 5  ;;  %v955_v52 = vshll.u32 %v835_v46, 16  ;;  %v959_v53 = vshrl.u32 %v835_v46, 16  ;;  %v836_v11 = vld [vmem:[#allocation2 + $0x38] sm:$0x1]  ;;  %1161 = vmatmul.bf16.gmra.mxu1 %v1077_v7  ;;  %v513_v7 = vshll.u32 %v401_v58, 16 }
  0x71   : > { %v1207_v0 = vld [vmem:[#allocation2 + $0x30] sm:$0xe]  ;;  %v1271_v13 = vrot.slane %v836_v11, 5  ;;  %v965_v57 = vshll.u32 %v836_v11, 16  ;;  %v521_v11 = vshll.u32 %v402_v60, 16 }
  0x72   : > { %v1270_v59 = vrot.slane %v1268_v51, 4  ;;  %v834_v16 = vld [vmem:[#allocation2 + $0x30] sm:$0xf]  ;;  %v2935_v17 = vrot.slane %v1207_v0, 9  ;;  %v957_v10 = vrot.slane %v955_v52, 5  ;;  %v961_v49 = vrot.slane %v959_v53, 4 }
  0x73   : > { %v3195_v8 = vld [vmem:[#allocation2 + $0x30] sm:$0xff]  ;;  %v946_v12 = vshrl.u32 %v834_v16, 16  ;;  %v949_v31 = vshll.u32 %v834_v16, 16  ;;  %v967_v1 = vrot.slane %v965_v57, 5  ;;  %v838_v36 = vld [vmem:[#allocation2 + $0x40] sm:$0xf] }
  0x74   : > { %v962_v18 = vor.u32 %v961_v49, %v957_v10  ;;  %785 = vmatmul.bf16.gmra.mxu3 %v3195_v8  ;;  %v1269_v23 = vsel %vm3573_vm14, %v2935_v17, %v1268_v51  ;;  %v1272_v24 = vsel %vm3573_vm14, %v1270_v59, %v1271_v13  ;;  %v1208_v38 = vld [vmem:[#allocation2 + $0x3c] sm:$0xe]  ;;  %v608_v41 = vld [vmem:[#allocation2 + $0x44] sm:$0x1]  ;;  %v1275_v42 = vrot.slane %v838_v36, 5 }
  0x75   : > { %v948_v15 = vrot.slane %v946_v12, 4  ;;  %v951_v50 = vrot.slane %v949_v31, 5  ;;  %v1319_v30 = vunpack.c.l.b16 %v1269_v23  ;;  %v1320_v14 = vunpack.c.l.b16 %v1272_v24  ;;  %v837_v47 = vld [vmem:[#allocation2 + $0x3c] sm:$0xf]  ;;  %v335_v51 = vld [vmem:[#allocation2 + $0x50] sm:$0x1] }
  0x76   : > { %v963_v3 = vrot.slane %v962_v18, 4  ;;  %v609_v46 = vsel %vm3361_vm2, %v508_v35, %v608_v41  ;;  %v3196_v43 = vld [vmem:[#allocation2 + $0x3c] sm:$0xff]  ;;  %v2936_v52 = vrot.slane %v1208_v38, 9  ;;  %v970_v53 = vshrl.u32 %v837_v47, 16  ;;  %v403_v41 = vld [vmem:[%s3388_s15 + $0x38] sm:$0xf] }
  0x77   : > { %v952_v28 = vor.u32 %v951_v50, %v948_v15  ;;  %v1331_v9 = vpack.c.b16 %v1320_v14, %v1319_v30  ;;  %610 = vst [vmem:[#allocation2 + $0x44] sm:$0x1] %v609_v46  ;;  %v973_v54 = vshll.u32 %v837_v47, 16  ;;  %v979_v55 = vshll.u32 %v838_v36, 16  ;;  %v611_v50 = vld [vmem:[#allocation2 + $0x48] sm:$0xf] }
  0x78   : > { %v968_v27 = vsel %vm3513_vm11, %v963_v3, %v967_v1  ;;  %v983_v56 = vshrl.u32 %v838_v36, 16  ;;  %v336_v62 = vsel %vm3368_vm4, 0, %v335_v51  ;;  %v972_v0 = vrot.slane %v970_v53, 4  ;;  %v312_v36 = vld [vmem:[#allocation2 + $0x54] sm:$0x1] }
  0x79   : > { %v953_v25 = vrot.slane %v952_v28, 4  ;;  %v1067_v34 = vunpack.c.l.b16 %v968_v27  ;;  %v975_v59 = vrot.slane %v973_v54, 5  ;;  %v981_v16 = vrot.slane %v979_v55, 5  ;;  %337 = vst [vmem:[#allocation2 + $0x50] sm:$0x1] %v336_v62 }
  0x7a   : > { %v985_v6 = vrot.slane %v983_v56, 4  ;;  %v518_v8 = vshrl.u32 %v402_v60, 16  ;;  %v512_v12 = vrot.slane %v510_v5, 7  ;;  %v1277_v31 = vrot.slane %v1275_v42, 4  ;;  %v404_v47 = vld [vmem:[%s3388_s15 + $0x3c] sm:$0xf] }
  0x7b   : > { %v958_v32 = vsel %vm3513_vm11, %v953_v25, %v957_v10  ;;  %1404 = vmatmul.bf16.gmra.mxu0 %v1328_v29  ;;  %1419 = vmatmul.bf16.gmra.mxu2 %v1331_v9  ;;  %v976_v17 = vor.u32 %v975_v59, %v972_v0  ;;  %v1276_v49 = vsel %vm3573_vm14, %v2936_v52, %v1275_v42  ;;  %v313_v9 = vsel %vm3361_vm2, 0, %v312_v36  ;;  %v3254_v56 = vld [vmem:[%s4159_s3 + $0xb8] sm:$0xff]  ;;  %v3237_v60 = vld [vmem:[%s4159_s3 + $0x30] sm:$0xff]  ;;  %v3236_v36 = vld [vmem:[%s4159_s3 + $0x28] sm:$0xff] }
  0x7c   : > { %v1066_v40 = vunpack.c.l.b16 %v958_v32  ;;  %v986_v13 = vor.u32 %v985_v6, %v981_v16  ;;  %v520_v10 = vrot.slane %v518_v8, 7  ;;  %v515_v48 = vor.u32 %v513_v7, %v512_v12  ;;  %v3238_v32 = vld [vmem:[%s4159_s3 + $0x38] sm:$0xff]  ;;  %314 = vst [vmem:[#allocation2 + $0x54] sm:$0x1] %v313_v9  ;;  %2480 = vmatpush.bf16.msrb.mxu1 %v3254_v56 }
  0x7d   : > { %v977_v57 = vrot.slane %v976_v17, 4  ;;  %v516_v15 = vrot.slane %v512_v12, 4  ;;  %v1321_v23 = vunpack.c.l.b16 %v1276_v49  ;;  %1836 = vmatpush.bf16.msrb.mxu3 %v3238_v32  ;;  %v338_v17 = vld [vmem:[#allocation2 + $0x5c] sm:$0x1] }
  0x7e   : > { %v1078_v45 = vpack.c.b16 %v1067_v34, %v1066_v40  ;;  %v839_v63 = vld [vmem:[#allocation2 + $0x44] sm:$0x1]  ;;  %v987_v61 = vrot.slane %v986_v13, 4  ;;  %v523_v18 = vor.u32 %v521_v11, %v520_v10  ;;  %v525_v1 = vrot.slane %v520_v10, 4 }
  0x7f   : > { %v1278_v19 = vrot.slane %v839_v63, 5  ;;  %v982_v28 = vsel %vm3513_vm11, %v977_v57, %v981_v16  ;;  %v989_v20 = vshll.u32 %v839_v63, 16  ;;  %v612_v21 = vsel %vm3413_vm8, %v515_v48, %v611_v50 }
  0x80   : > { %1166 = vmatmul.bf16.gmra.mxu1 %v1078_v45  ;;  %v524_v24 = vsel %vm3407_vm7, %v516_v15, %v523_v18  ;;  %613 = vst [vmem:[#allocation2 + $0x48] sm:$0xf] %v612_v21  ;;  %v615_v3 = vld [vmem:[#allocation2 + $0x50] sm:$0x1]  ;;  %v1068_v14 = vunpack.c.l.b16 %v982_v28  ;;  %v527_v11 = vshrl.u32 %v403_v41, 16  ;;  %v530_v13 = vshll.u32 %v403_v41, 16 }
  0x81   : > { %v1279_v25 = vsel %vm3573_vm14, %v1277_v31, %v1278_v19  ;;  %v991_v27 = vrot.slane %v989_v20, 5  ;;  %614 = vst [vmem:[#allocation2 + $0x4c] sm:$0xf] %v524_v24  ;;  %v616_v29 = vsel %vm3361_vm2, %v525_v1, %v615_v3  ;;  %1837 = vmatpush.bf16.msrb.mxu3 %v3237_v60  ;;  %v535_v10 = vshrl.u32 %v404_v47, 16 }
  0x82   : > { %v1322_v30 = vunpack.c.l.b16 %v1279_v25  ;;  %617 = vst [vmem:[#allocation2 + $0x50] sm:$0x1] %v616_v29  ;;  %v529_v15 = vrot.slane %v527_v11, 7  ;;  %v339_v1 = vsel %vm3368_vm4, 0, %v338_v17 }
  0x83   : > { %v992_v40 = vsel %vm3513_vm11, %v987_v61, %v991_v27  ;;  %v537_v63 = vrot.slane %v535_v10, 7  ;;  %v538_v61 = vshll.u32 %v404_v47, 16  ;;  %v618_v18 = vld [vmem:[#allocation2 + $0x54] sm:$0xf]  ;;  %340 = vst [vmem:[#allocation2 + $0x5c] sm:$0x1] %v339_v1 }
  0x84   : > { %790 = vmatmul.bf16.gmra.mxu3 %v3196_v43  ;;  %v1332_v34 = vpack.c.b16 %v1322_v30, %v1321_v23  ;;  %v1069_v35 = vunpack.c.l.b16 %v992_v40  ;;  %v532_v20 = vor.u32 %v530_v13, %v529_v15  ;;  %v533_v21 = vrot.slane %v529_v15, 4 }
  0x85   : > { %v540_v24 = vor.u32 %v538_v61, %v537_v63  ;;  %1838 = vmatpush.bf16.msrb.mxu3 %v3236_v36  ;;  %v3251_v61 = vld [vmem:[%s4159_s3 + $0xa0] sm:$0xff] }
  0x86   : > { %v1079_v38 = vpack.c.b16 %v1069_v35, %v1068_v14  ;;  %v619_v27 = vsel %vm3413_vm8, %v532_v20, %v618_v18  ;;  %v542_v14 = vrot.slane %v537_v63, 4  ;;  %v3253_v35 = vld [vmem:[%s4159_s3 + $0xb0] sm:$0xff]  ;;  %v3234_v18 = vld [vmem:[%s4159_s3 + $0x18] sm:$0xff]  ;;  %v341_v20 = vld [vmem:[#allocation3] sm:$0x1] }
  0x87   : > { %v840_v39 = vld [vmem:[#allocation2 + $0x48] sm:$0xf]  ;;  %v541_v29 = vsel %vm3407_vm7, %v533_v21, %v540_v24  ;;  %620 = vst [vmem:[#allocation2 + $0x54] sm:$0xf] %v619_v27  ;;  %2481 = vmatpush.bf16.msrb.mxu1 %v3253_v35  ;;  %v342_v21 = vsel %vm3361_vm2, 0, %v341_v20 }
  0x88   : > { %v841_v42 = vld [vmem:[#allocation2 + $0x4c] sm:$0xf]  ;;  %v1209_v44 = vld [vmem:[#allocation2 + $0x48] sm:$0xe]  ;;  %v994_v45 = vshrl.u32 %v840_v39, 16  ;;  %v997_v46 = vshll.u32 %v840_v39, 16 }
  0x89   : > { %v842_v51 = vld [vmem:[#allocation2 + $0x50] sm:$0x1]  ;;  %v2937_v43 = vrot.slane %v1209_v44, 9  ;;  %v1282_v52 = vrot.slane %v841_v42, 5  ;;  %v1003_v53 = vshll.u32 %v841_v42, 16  ;;  %v1007_v54 = vshrl.u32 %v841_v42, 16 }
  0x8a   : > { %v3197_v55 = vld [vmem:[#allocation2 + $0x48] sm:$0xff]  ;;  %v1285_v58 = vrot.slane %v842_v51, 5  ;;  %v996_v62 = vrot.slane %v994_v45, 4  ;;  %v999_v0 = vrot.slane %v997_v46, 5  ;;  %v1013_v8 = vshll.u32 %v842_v51, 16 }
  0x8b   : > { %1424 = vmatmul.bf16.gmra.mxu2 %v1332_v34  ;;  %v1283_v59 = vsel %vm3573_vm14, %v2937_v43, %v1282_v52  ;;  %v1284_v16 = vrot.slane %v1282_v52, 4  ;;  %v1005_v5 = vrot.slane %v1003_v53, 5  ;;  %v1009_v6 = vrot.slane %v1007_v54, 4  ;;  %621 = vst [vmem:[#allocation2 + $0x58] sm:$0xf] %v541_v29 }
  0x8c   : > { %v1000_v7 = vor.u32 %v999_v0, %v996_v62  ;;  %v1323_v49 = vunpack.c.l.b16 %v1283_v59  ;;  %v1015_v48 = vrot.slane %v1013_v8, 5  ;;  %v622_v40 = vld [vmem:[#allocation2 + $0x5c] sm:$0x1]  ;;  %v3235_v8 = vld [vmem:[%s4159_s3 + $0x20] sm:$0xff]  ;;  %343 = vst [vmem:[#allocation3] sm:$0x1] %v342_v21 }
  0x8d   : > { %v1286_v12 = vsel %vm3573_vm14, %v1284_v16, %v1285_v58  ;;  %v1010_v31 = vor.u32 %v1009_v6, %v1005_v5  ;;  %v623_v34 = vsel %vm3361_vm2, %v542_v14, %v622_v40  ;;  %1839 = vmatpush.bf16.msrb.mxu3 %v3235_v8  ;;  %v344_v35 = vld [vmem:[#allocation3 + $0xc] sm:$0x1]  ;;  %v3778_v36 = vld [vmem:[%s4158_s2] ss:$0 sm:$0xff] }
  0x8e   : > { %v1001_v57 = vrot.slane %v1000_v7, 4  ;;  %v1324_v19 = vunpack.c.l.b16 %v1286_v12  ;;  %624 = vst [vmem:[#allocation2 + $0x5c] sm:$0x1] %v623_v34  ;;  %v1210_v9 = vld [vmem:[#allocation2 + $0x54] sm:$0xe]  ;;  %v3252_v7 = vld [vmem:[%s4159_s3 + $0xa8] sm:$0xff] }
  0x8f   : > { %v1011_v50 = vrot.slane %v1010_v31, 4  ;;  %v2938_v41 = vrot.slane %v1210_v9, 9  ;;  %v843_v42 = vld [vmem:[#allocation2 + $0x54] sm:$0xf]  ;;  %2482 = vmatpush.bf16.msrb.mxu1 %v3252_v7  ;;  %v3244_v34 = vld [vmem:[%s4159_s3 + $0x68] sm:$0xff]  ;;  %v345_v9 = vsel %vm3361_vm2, 0, %v344_v35 }
  0x90   : > { %1171 = vmatmul.bf16.gmra.mxu1 %v1079_v38  ;;  %v1006_v28 = vsel %vm3513_vm11, %v1001_v57, %v1005_v5  ;;  %v1333_v30 = vpack.c.b16 %v1324_v19, %v1323_v49  ;;  %v1018_v45 = vshrl.u32 %v843_v42, 16  ;;  %v1021_v46 = vshll.u32 %v843_v42, 16  ;;  %v3250_v19 = vld [vmem:[%s4159_s3 + $0x98] sm:$0xff]  ;;  %346 = vst [vmem:[#allocation3 + $0xc] sm:$0x1] %v345_v9  ;;  %v3239_v9 = vld [vmem:[%s4159_s3 + $0x40] sm:$0xff] }
  0x91   : > { %v1016_v23 = vsel %vm3513_vm11, %v1011_v50, %v1015_v48  ;;  %v1070_v3 = vunpack.c.l.b16 %v1006_v28  ;;  %1840 = vmatpush.bf16.msrb.mxu3 %v3234_v18  ;;  %v3233_v28 = vld [vmem:[%s4159_s3 + $0x10] sm:$0xff]  ;;  %v3247_v18 = vld [vmem:[%s4159_s3 + $0x80] sm:$0xff] }
  0x92   : > { %v1071_v25 = vunpack.c.l.b16 %v1016_v23  ;;  %v3198_v38 = vld [vmem:[#allocation2 + $0x54] sm:$0xff]  ;;  %v1020_v43 = vrot.slane %v1018_v45, 4  ;;  %v1023_v52 = vrot.slane %v1021_v46, 5 }
  0x93   : > { %v844_v39 = vld [vmem:[#allocation2 + $0x58] sm:$0xf]  ;;  %2483 = vmatpush.bf16.msrb.mxu1 %v3251_v61 }
  0x94   : > { %795 = vmatmul.bf16.gmra.mxu3 %v3197_v55  ;;  %v1080_v32 = vpack.c.b16 %v1071_v25, %v1070_v3  ;;  %v1289_v44 = vrot.slane %v844_v39, 5  ;;  %v1027_v47 = vshll.u32 %v844_v39, 16  ;;  %v1031_v51 = vshrl.u32 %v844_v39, 16  ;;  %v365_v3 = vld [vmem:[#allocation3 + $0x8] sm:$0x1]  ;;  %v3246_v25 = vld [vmem:[%s4159_s3 + $0x78] sm:$0xff] }
  0x95   : > { %v845_v58 = vld [vmem:[#allocation2 + $0x5c] sm:$0x1]  ;;  %v1024_v60 = vor.u32 %v1023_v52, %v1020_v43  ;;  %1841 = vmatpush.bf16.msrb.mxu3 %v3233_v28  ;;  %v366_v27 = vsel %vm3368_vm4, 0, %v365_v3  ;;  %2230 = vmatpush.bf16.msrb.mxu0 %v3246_v25  ;;  %v3232_v39 = vld [vmem:[%s4159_s3 + $0x8] sm:$0xff]  ;;  %v3231_v52 = vld [vmem:[%s4159_s3] sm:$0xff] }
  0x96   : > { %v1290_v53 = vsel %vm3573_vm14, %v2938_v41, %v1289_v44  ;;  %v1291_v54 = vrot.slane %v1289_v44, 4  ;;  %v1029_v55 = vrot.slane %v1027_v47, 5  ;;  %v1033_v56 = vrot.slane %v1031_v51, 4  ;;  %367 = vst [vmem:[#allocation3 + $0x8] sm:$0x1] %v366_v27  ;;  %v3243_v44 = vld [vmem:[%s4159_s3 + $0x60] sm:$0xff] }
  0x97   : > { %v1292_v0 = vrot.slane %v845_v58, 5  ;;  %v1037_v16 = vshll.u32 %v845_v58, 16  ;;  %v1325_v5 = vunpack.c.l.b16 %v1290_v53  ;;  %v1025_v6 = vrot.slane %v1024_v60, 4  ;;  %2484 = vmatpush.bf16.msrb.mxu1 %v3250_v19  ;;  %v3240_v19 = vld [vmem:[%s4159_s3 + $0x48] sm:$0xff] }
  0x98   : > { %v1034_v59 = vor.u32 %v1033_v56, %v1029_v55  ;;  %v368_v56 = vld [vmem:[#allocation3 + $0x14] sm:$0x1] }
  0x99   : > { %v1293_v11 = vsel %vm3573_vm14, %v1291_v54, %v1292_v0  ;;  %v1039_v12 = vrot.slane %v1037_v16, 5  ;;  %v1030_v13 = vsel %vm3513_vm11, %v1025_v6, %v1029_v55  ;;  %1842 = vmatpush.bf16.msrb.mxu3 %v3232_v39  ;;  %v3242_v54 = vld [vmem:[%s4159_s3 + $0x58] sm:$0xff]  ;;  %v369_v0 = vsel %vm3368_vm4, 0, %v368_v56 }
  0x9a   : > { %v1035_v17 = vrot.slane %v1034_v59, 4  ;;  %v1326_v31 = vunpack.c.l.b16 %v1293_v11  ;;  %v1072_v49 = vunpack.c.l.b16 %v1030_v13  ;;  %v347_v59 = vld [vmem:[#allocation3 + $0x18] sm:$0x1]  ;;  %370 = vst [vmem:[#allocation3 + $0x14] sm:$0x1] %v369_v0 }
  0x9b   : > { %1429 = vmatmul.bf16.gmra.mxu2 %v1333_v30  ;;  %v3245_v30 = vld [vmem:[%s4159_s3 + $0x70] sm:$0xff]  ;;  %v348_v7 = vsel %vm3361_vm2, 0, %v347_v59 }
  0x9c   : > { %v1040_v10 = vsel %vm3513_vm11, %v1035_v17, %v1039_v12  ;;  %v1334_v57 = vpack.c.b16 %v1326_v31, %v1325_v5  ;;  %2231 = vmatpush.bf16.msrb.mxu0 %v3245_v30  ;;  %v3248_v5 = vld [vmem:[%s4159_s3 + $0x88] sm:$0xff]  ;;  %349 = vst [vmem:[#allocation3 + $0x18] sm:$0x1] %v348_v7 }
  0x9d   : > { %v1073_v48 = vunpack.c.l.b16 %v1040_v10  ;;  %1843 = vmatpush.bf16.msrb.mxu3 %v3231_v52  ;;  %v1648_v52 = vld [vmem:[#allocation3] sm:$0xf] }
  0x9f   : > { %v1081_v15 = vpack.c.b16 %v1073_v48, %v1072_v49 }
  0xa0   : > { %1176 = vmatmul.bf16.gmra.mxu1 %v1080_v32  ;;  %2232 = vmatpush.bf16.msrb.mxu0 %v3244_v34 }
  0xa4   : > { %800 = vmatmul.bf16.gmra.mxu3 %v3198_v38  ;;  %v3249_v38 = vld [vmem:[%s4159_s3 + $0x90] sm:$0xff]  ;;  %2233 = vmatpush.bf16.msrb.mxu0 %v3243_v44  ;;  %v350_v44 = vld [vmem:[#allocation3 + $0x24] sm:$0x1] }
  0xa5   : > { %2485 = vmatpush.bf16.msrb.mxu1 %v3249_v38 }
  0xa8   : > { %v3726_v62 = vpop.f32.mrf.mxu0  ;;  %2234 = vmatpush.bf16.msrb.mxu0 %v3242_v54 }
  0xa9   : > { %v806_v60 = vadd.f32 %v3778_v36, %v3726_v62  ;;  %v3241_v62 = vld [vmem:[%s4159_s3 + $0x50] sm:$0xff]  ;;  %2486 = vmatpush.bf16.msrb.mxu1 %v3248_v5 }
  0xab   : > { %1434 = vmatmul.bf16.gmra.mxu2 %v1334_v57  ;;  %v371_v57 = vld [vmem:[#allocation3 + $0x20] sm:$0x1] }
  0xac   : > { %2235 = vmatpush.bf16.msrb.mxu0 %v3241_v62 }
  0xad   : > { %2487 = vmatpush.bf16.msrb.mxu1 %v3247_v18  ;;  %v1652_v18 = vld [vmem:[#allocation3 + $0x8] sm:$0x1] }
  0xb0   : > { %v3740_v50 = vpop.f32.mrf.mxu0  ;;  %1181 = vmatmul.bf16.gmra.mxu1 %v1081_v15  ;;  %v372_v15 = vsel %vm3368_vm4, 0, %v371_v57  ;;  %2236 = vmatpush.bf16.msrb.mxu0 %v3240_v19 }
  0xb1   : > { %373 = vst [vmem:[#allocation3 + $0x20] sm:$0x1] %v372_v15  ;;  %v807_v21 = vadd.f32 %v3778_v36, %v3740_v50 }
  0xb4   : > { %2237 = vmatpush.bf16.msrb.mxu0 %v3239_v9 }
  0xb8   : > { %v3742_v63 = vpop.f32.mrf.mxu0 }
  0xb9   : > { %v808_v5 = vadd.f32 %v3778_v36, %v3742_v63 }
  0xc0   : > { %v3750_v1 = vpop.f32.mrf.mxu0 }
  0xc8   : > { %v1147_v23 = vpop.f32.mrf.mxu0 }
  0xc9   : > { %v1187_v6 = vadd.f32 %v1147_v23, %v806_v60  ;;  %v1666_v60 = vld [vmem:[#allocation3 + $0x20] sm:$0x1] }
  0xd0   : > { %v3760_v24 = vpop.f32.mrf.mxu0 }
  0xd1   : > { %v1188_v30 = vadd.f32 %v3760_v24, %v807_v21 }
  0xd3   : > { %v776_v29 = vpop.f32.mrf.mxu3 }
  0xd4   : > { %v810_v41 = vadd.f32 %v3778_v36, %v776_v29 }
  0xd8   : > { %v3770_v14 = vpop.f32.mrf.mxu0 }
  0xd9   : > { %v1189_v62 = vadd.f32 %v3770_v14, %v808_v5 }
  0xdb   : > { %v778_v42 = vpop.f32.mrf.mxu3 }
  0xdc   : > { %v811_v46 = vadd.f32 %v3778_v36, %v778_v42 }
  0xdd   : > { %v1157_v32 = vpop.f32.mrf.mxu1 }
  0xde   : > { %v1410_v40 = vpop.f32.mrf.mxu2  ;;  %v1191_v47 = vadd.f32 %v1157_v32, %v810_v41 }
  0xe0   : > { %v3792_v45 = vpop.f32.mrf.mxu0  ;;  %v1444_v55 = vadd.f32 %v1410_v40, %v1191_v47  ;;  %v1662_v40 = vld [vmem:[#allocation3 + $0x18] sm:$0xf] }
  0xe2   : > { %v1460_v16 = vmax.f32 %v1444_v55, 0.0 }
  0xe4   : > { %v1476_v12 = vpack.c.bf16 %v1460_v16, %v1460_v16 }
  0xe5   : > { %v1159_v51 = vpop.f32.mrf.mxu1 }
  0xe6   : > { %v1192_v43 = vadd.f32 %v1159_v51, %v811_v46  ;;  %v1412_v53 = vpop.f32.mrf.mxu2  ;;  %v1523_v10 = vshrl.u32 %v1476_v12, 16  ;;  %v1526_v49 = vshll.u32 %v1476_v12, 16  ;;  %v374_v46 = vld [vmem:[#allocation3 + $0x2c] sm:$0x1] }
  0xe7   : > { %v781_v11 = vpop.f32.mrf.mxu3  ;;  %v375_v55 = vsel %vm3368_vm4, 0, %v374_v46 }
  0xe8   : > { %v1445_v58 = vadd.f32 %v1412_v53, %v1192_v43  ;;  %v1400_v17 = vpop.f32.mrf.mxu0  ;;  %v1525_v28 = vrot.slane %v1523_v10, 7  ;;  %v812_v42 = vadd.f32 %v3778_v36, %v781_v11  ;;  %v351_v43 = vsel %vm3361_vm2, 0, %v350_v44  ;;  %376 = vst [vmem:[#allocation3 + $0x2c] sm:$0x1] %v375_v55 }
  0xe9   : > { %v1440_v31 = vadd.f32 %v1400_v17, %v1187_v6  ;;  %352 = vst [vmem:[#allocation3 + $0x24] sm:$0x1] %v351_v43 }
  0xea   : > { %v1461_v8 = vmax.f32 %v1445_v58, 0.0  ;;  %v1528_v25 = vor.u32 %v1526_v49, %v1525_v28  ;;  %v1529_v27 = vrot.slane %v1525_v28, 4 }
  0xeb   : > { %v1456_v48 = vmax.f32 %v1440_v31, 0.0 }
  0xec   : > { %v1477_v13 = vpack.c.bf16 %v1461_v8, %v1461_v8  ;;  %v1663_v50 = vsel %vm3413_vm8, %v1528_v25, %v1662_v40  ;;  %v809_v25 = vadd.f32 %v3778_v36, %v3750_v1 }
  0xed   : > { %v1472_v23 = vpack.c.bf16 %v1456_v48, %v1456_v48  ;;  %v1162_v29 = vpop.f32.mrf.mxu1  ;;  %1664 = vst [vmem:[#allocation3 + $0x18] sm:$0xf] %v1663_v50 }
  0xee   : > { %v1531_v61 = vshrl.u32 %v1477_v13, 16  ;;  %v1534_v20 = vshll.u32 %v1477_v13, 16  ;;  %v1193_v53 = vadd.f32 %v1162_v29, %v812_v42  ;;  %v1415_v54 = vpop.f32.mrf.mxu2  ;;  %v353_v13 = vld [vmem:[#allocation3 + $0x30] sm:$0x1]  ;;  %v1190_v1 = vadd.f32 %v3792_v45, %v809_v25 }
  0xef   : > { %v1489_v32 = vshrl.u32 %v1472_v23, 16  ;;  %v783_v35 = vpop.f32.mrf.mxu3  ;;  %v1492_v38 = vshll.u32 %v1472_v23, 16  ;;  %v354_v57 = vsel %vm3361_vm2, 0, %v353_v13 }
  0xf0   : > { %v1533_v3 = vrot.slane %v1531_v61, 7  ;;  %v1402_v39 = vpop.f32.mrf.mxu0  ;;  %v813_v0 = vadd.f32 %v3778_v36, %v783_v35  ;;  %v1446_v16 = vadd.f32 %v1415_v54, %v1193_v53  ;;  %355 = vst [vmem:[#allocation3 + $0x30] sm:$0x1] %v354_v57  ;;  %v1669_v40 = vld [vmem:[#allocation3 + $0x24] sm:$0xf] }
  0xf1   : > { %v1491_v47 = vrot.slane %v1489_v32, 7  ;;  %v1441_v24 = vadd.f32 %v1402_v39, %v1188_v30  ;;  %v1673_v57 = vld [vmem:[#allocation3 + $0x2c] sm:$0x1] }
  0xf2   : > { %v1536_v34 = vor.u32 %v1534_v20, %v1533_v3  ;;  %v1538_v41 = vrot.slane %v1533_v3, 4  ;;  %v1462_v8 = vmax.f32 %v1446_v16, 0.0 }
  0xf3   : > { %v1494_v56 = vor.u32 %v1492_v38, %v1491_v47  ;;  %v1457_v58 = vmax.f32 %v1441_v24, 0.0  ;;  %v1495_v61 = vrot.slane %v1491_v47, 4 }
  0xf4   : > { %v1537_v51 = vsel %vm3407_vm7, %v1529_v27, %v1536_v34  ;;  %v1667_v59 = vsel %vm3361_vm2, %v1538_v41, %v1666_v60  ;;  %v1478_v49 = vpack.c.bf16 %v1462_v8, %v1462_v8 }
  0xf5   : > { %1665 = vst [vmem:[#allocation3 + $0x1c] sm:$0xf] %v1537_v51  ;;  %v1649_v6 = vsel %vm3413_vm8, %v1494_v56, %v1648_v52  ;;  %v1473_v7 = vpack.c.bf16 %v1457_v58, %v1457_v58  ;;  %v1164_v11 = vpop.f32.mrf.mxu1  ;;  %v377_v52 = vld [vmem:[#allocation3 + $0x38] sm:$0x1]  ;;  %v1655_v58 = vld [vmem:[#allocation3 + $0xc] sm:$0xf] }
  0xf6   : > { %1668 = vst [vmem:[#allocation3 + $0x20] sm:$0x1] %v1667_v59  ;;  %v1194_v12 = vadd.f32 %v1164_v11, %v813_v0  ;;  %v1540_v19 = vshrl.u32 %v1478_v49, 16  ;;  %v1543_v28 = vshll.u32 %v1478_v49, 16  ;;  %v1417_v20 = vpop.f32.mrf.mxu2  ;;  %v378_v16 = vsel %vm3368_vm4, 0, %v377_v52 }
  0xf7   : > { %1650 = vst [vmem:[#allocation3] sm:$0xf] %v1649_v6  ;;  %v1497_v17 = vshrl.u32 %v1473_v7, 16  ;;  %v786_v31 = vpop.f32.mrf.mxu3  ;;  %v1500_v48 = vshll.u32 %v1473_v7, 16 }
  0xf8   : > { %v1405_v10 = vpop.f32.mrf.mxu0  ;;  %v1447_v3 = vadd.f32 %v1417_v20, %v1194_v12  ;;  %v3848_v27 = vrot.slane %v1540_v19, 7  ;;  %v814_v39 = vadd.f32 %v3778_v36, %v786_v31  ;;  %379 = vst [vmem:[#allocation3 + $0x38] sm:$0x1] %v378_v16 }
  0xf9   : > { %v1499_v63 = vrot.slane %v1497_v17, 7  ;;  %v1442_v15 = vadd.f32 %v1405_v10, %v1189_v62 }
  0xfa   : > { %v1463_v34 = vmax.f32 %v1447_v3, 0.0  ;;  %v1545_v9 = vor.u32 %v1543_v28, %v3848_v27  ;;  %v1546_v8 = vrot.slane %v3848_v27, 4  ;;  %v1659_v3 = vld [vmem:[#allocation3 + $0x14] sm:$0x1] }
  0xfb   : > { %v1502_v21 = vor.u32 %v1500_v48, %v1499_v63  ;;  %v1504_v14 = vrot.slane %v1499_v63, 4  ;;  %v1458_v23 = vmax.f32 %v1442_v15, 0.0 }
  0xfc   : > { %v1479_v42 = vpack.c.bf16 %v1463_v34, %v1463_v34  ;;  %v1670_v51 = vsel %vm3413_vm8, %v1545_v9, %v1669_v40 }
  0xfd   : > { %v1503_v29 = vsel %vm3407_vm7, %v1495_v61, %v1502_v21  ;;  %v1653_v30 = vsel %vm3361_vm2, %v1504_v14, %v1652_v18  ;;  %v1474_v32 = vpack.c.bf16 %v1458_v23, %v1458_v23  ;;  %v1167_v50 = vpop.f32.mrf.mxu1  ;;  %1671 = vst [vmem:[#allocation3 + $0x24] sm:$0xf] %v1670_v51 }
  0xfe   : > { %v1901_v35 = vld [vmem:[#allocation3] sm:$0xf]  ;;  %1651 = vst [vmem:[#allocation3 + $0x4] sm:$0xf] %v1503_v29  ;;  %v1548_v55 = vshrl.u32 %v1479_v42, 16  ;;  %v1551_v56 = vshll.u32 %v1479_v42, 16  ;;  %v1195_v0 = vadd.f32 %v1167_v50, %v814_v39  ;;  %v1420_v59 = vpop.f32.mrf.mxu2 }
  0xff   : > { %v1926_v38 = vshrl.u32 %v1901_v35, 16  ;;  %1654 = vst [vmem:[#allocation3 + $0x8] sm:$0x1] %v1653_v30  ;;  %v1506_v41 = vshrl.u32 %v1474_v32, 16  ;;  %v1929_v44 = vshll.u32 %v1901_v35, 16  ;;  %v788_v46 = vpop.f32.mrf.mxu3  ;;  %v1509_v47 = vshll.u32 %v1474_v32, 16 }
 0x100   : > { %v1407_v24 = vpop.f32.mrf.mxu0  ;;  %v2295_v43 = vld [vmem:[#allocation3] sm:$0xe]  ;;  %v1550_v7 = vrot.slane %v1548_v55, 7  ;;  %v815_v62 = vadd.f32 %v3778_v36, %v788_v46  ;;  %v1448_v18 = vadd.f32 %v1420_v59, %v1195_v0 }
 0x101   : > { %v3859_v53 = vrot.slane %v1506_v41, 7  ;;  %v1443_v54 = vadd.f32 %v1407_v24, %v1190_v1  ;;  %v1928_v45 = vrot.slane %v1926_v38, 4  ;;  %v1931_v60 = vrot.slane %v1929_v44, 5 }
 0x102   : > { %v3099_v11 = vrot.slane %v2295_v43, 9  ;;  %v1553_v10 = vor.u32 %v1551_v56, %v1550_v7  ;;  %v1555_v49 = vrot.slane %v1550_v7, 4  ;;  %v1464_v50 = vmax.f32 %v1448_v18, 0.0 }
 0x103   : > { %v1511_v5 = vor.u32 %v1509_v47, %v3859_v53  ;;  %v1459_v6 = vmax.f32 %v1443_v54, 0.0  ;;  %v1932_v61 = vor.u32 %v1931_v60, %v1928_v45  ;;  %v1512_v28 = vrot.slane %v3859_v53, 4 }
 0x104   : > { %v1554_v29 = vsel %vm3407_vm7, %v1546_v8, %v1553_v10  ;;  %v1674_v30 = vsel %vm3361_vm2, %v1555_v49, %v1673_v57  ;;  %v1480_v43 = vpack.c.bf16 %v1464_v50, %v1464_v50 }
 0x105   : > { %v1656_v17 = vsel %vm3413_vm8, %v1511_v5, %v1655_v58  ;;  %v1475_v12 = vpack.c.bf16 %v1459_v6, %v1459_v6  ;;  %v3223_v31 = vld [vmem:[#allocation3] sm:$0xff]  ;;  %v1169_v19 = vpop.f32.mrf.mxu1  ;;  %1672 = vst [vmem:[#allocation3 + $0x28] sm:$0xf] %v1554_v29  ;;  %v1933_v38 = vrot.slane %v1932_v61, 4  ;;  %v356_v58 = vld [vmem:[#allocation3 + $0x3c] sm:$0x1] }
 0x106   : > { %v1902_v13 = vld [vmem:[#allocation3 + $0x4] sm:$0xf]  ;;  %1657 = vst [vmem:[#allocation3 + $0xc] sm:$0xf] %v1656_v17  ;;  %v1903_v63 = vld [vmem:[#allocation3 + $0x8] sm:$0x1]  ;;  %1844 = vmatmul.bf16.vlgmr.msrb.gmra.mxu3 %v3223_v31  ;;  %v1422_v1 = vpop.f32.mrf.mxu2  ;;  %v1196_v46 = vadd.f32 %v1169_v19, %v815_v62 }
 0x107   : > { %v1935_v48 = vshll.u32 %v1902_v13, 16  ;;  %v1939_v15 = vshrl.u32 %v1902_v13, 16  ;;  %v1514_v20 = vshrl.u32 %v1475_v12, 16  ;;  %v1517_v21 = vshll.u32 %v1475_v12, 16  ;;  %v791_v23 = vpop.f32.mrf.mxu3  ;;  %1675 = vst [vmem:[#allocation3 + $0x2c] sm:$0x1] %v1674_v30 }
 0x108   : > { %v2329_v14 = vrot.slane %v1902_v13, 5  ;;  %v1945_v27 = vshll.u32 %v1903_v63, 16  ;;  %v2332_v35 = vrot.slane %v1903_v63, 5  ;;  %v1449_v55 = vadd.f32 %v1422_v1, %v1196_v46  ;;  %v1676_v12 = vld [vmem:[#allocation3 + $0x30] sm:$0xf] }
 0x109   : > { %v1941_v25 = vrot.slane %v1939_v15, 4  ;;  %v1516_v32 = vrot.slane %v1514_v20, 7  ;;  %v1937_v39 = vrot.slane %v1935_v48, 5  ;;  %v1557_v0 = vshrl.u32 %v1480_v43, 16  ;;  %v3899_v46 = vld [vmem:[#allocation3 + $0x20] sm:$0x1] }
 0x10a   : > { %v2330_v40 = vsel %vm3573_vm14, %v3099_v11, %v2329_v14  ;;  %v2331_v34 = vrot.slane %v2329_v14, 4  ;;  %v1947_v54 = vrot.slane %v1945_v27, 5  ;;  %v1560_v59 = vshll.u32 %v1480_v43, 16 }
 0x10b   : > { %v2400_v9 = vunpack.c.l.b16 %v2330_v40  ;;  %v1519_v41 = vor.u32 %v1517_v21, %v1516_v32  ;;  %v1521_v42 = vrot.slane %v1516_v32, 4  ;;  %v3879_v24 = vsel %vm3513_vm11, %v1933_v38, %v1937_v39  ;;  %v3894_v21 = vld [vmem:[#allocation3 + $0x1c] sm:$0xf] }
 0x10c   : > { %v2333_v44 = vsel %vm3573_vm14, %v2331_v34, %v2332_v35  ;;  %v1942_v51 = vor.u32 %v1941_v25, %v1937_v39  ;;  %v2150_v5 = vunpack.c.l.b16 %v3879_v24  ;;  %v1465_v6 = vmax.f32 %v1449_v55, 0.0  ;;  %v1680_v25 = vld [vmem:[#allocation3 + $0x38] sm:$0x1] }
 0x10d   : > { %v2401_v47 = vunpack.c.l.b16 %v2333_v44  ;;  %v1520_v52 = vsel %vm3407_vm7, %v1512_v28, %v1519_v41  ;;  %v1660_v53 = vsel %vm3361_vm2, %v1521_v42, %v1659_v3  ;;  %v1904_v56 = vld [vmem:[#allocation3 + $0xc] sm:$0xf]  ;;  %v1172_v16 = vpop.f32.mrf.mxu1  ;;  %v1559_v17 = vrot.slane %v1557_v0, 7 }
 0x10e   : > { %1658 = vst [vmem:[#allocation3 + $0x10] sm:$0xf] %v1520_v52  ;;  %v1943_v60 = vrot.slane %v1942_v51, 4  ;;  %v1950_v7 = vshrl.u32 %v1904_v56, 16  ;;  %v1953_v8 = vshll.u32 %v1904_v56, 16  ;;  %v816_v31 = vadd.f32 %v3778_v36, %v791_v23  ;;  %v1425_v18 = vpop.f32.mrf.mxu2 }
 0x10f   : > { %v2416_v45 = vpack.c.b16 %v2401_v47, %v2400_v9  ;;  %1661 = vst [vmem:[#allocation3 + $0x14] sm:$0x1] %v1660_v53  ;;  %v793_v11 = vpop.f32.mrf.mxu3  ;;  %v357_v13 = vsel %vm3361_vm2, 0, %v356_v58  ;;  %v2296_v49 = vld [vmem:[#allocation3 + $0xc] sm:$0xe]  ;;  %v1481_v57 = vpack.c.bf16 %v1465_v6, %v1465_v6  ;;  %v1562_v15 = vor.u32 %v1560_v59, %v1559_v17 }
 0x110   : > { %v3888_v62 = vsel %vm3513_vm11, %v1943_v60, %v1947_v54  ;;  %v1952_v63 = vrot.slane %v1950_v7, 4  ;;  %v1955_v48 = vrot.slane %v1953_v8, 5  ;;  %358 = vst [vmem:[#allocation3 + $0x3c] sm:$0x1] %v357_v13  ;;  %v1197_v61 = vadd.f32 %v1172_v16, %v816_v31  ;;  %v2297_v54 = vld [vmem:[#allocation3 + $0x18] sm:$0xe] }
 0x111   : > { %2488 = vmatmul.bf16.vlgmr.msrb.gmra.mxu1 %v2416_v45  ;;  %v2151_v10 = vunpack.c.l.b16 %v3888_v62  ;;  %v1565_v28 = vshrl.u32 %v1481_v57, 16  ;;  %v1568_v20 = vshll.u32 %v1481_v57, 16  ;;  %v1563_v14 = vrot.slane %v1559_v17, 4  ;;  %v1907_v60 = vld [vmem:[#allocation3 + $0x18] sm:$0xf] }
 0x112   : > { %v1677_v23 = vsel %vm3413_vm8, %v1562_v15, %v1676_v12  ;;  %v3100_v3 = vrot.slane %v2296_v49, 9  ;;  %v2343_v27 = vrot.slane %v3894_v21, 5  ;;  %v1956_v40 = vor.u32 %v1955_v48, %v1952_v63  ;;  %v380_v6 = vld [vmem:[#allocation3 + $0x44] sm:$0x1] }
 0x113   : > { %v2166_v19 = vpack.c.b16 %v2151_v10, %v2150_v5  ;;  %1678 = vst [vmem:[#allocation3 + $0x30] sm:$0xf] %v1677_v23  ;;  %v1567_v32 = vrot.slane %v1565_v28, 7  ;;  %v1450_v39 = vadd.f32 %v1425_v18, %v1197_v61  ;;  %v817_v45 = vadd.f32 %v3778_v36, %v793_v11 }
 0x114   : > { %v1957_v58 = vrot.slane %v1956_v40, 4  ;;  %v2346_v5 = vrot.slane %v3899_v46, 5  ;;  %v3101_v31 = vrot.slane %v2297_v54, 9  ;;  %v2345_v49 = vrot.slane %v2343_v27, 4 }
 0x115   : > { %2238 = vmatmul.bf16.vlgmr.msrb.gmra.mxu0 %v2166_v19  ;;  %v3224_v29 = vld [vmem:[#allocation3 + $0xc] sm:$0xff]  ;;  %v1174_v50 = vpop.f32.mrf.mxu1  ;;  %v1570_v41 = vor.u32 %v1568_v20, %v1567_v32  ;;  %v1572_v42 = vrot.slane %v1567_v32, 4  ;;  %v1466_v16 = vmax.f32 %v1450_v39, 0.0  ;;  %v381_v48 = vsel %vm3368_vm4, 0, %v380_v6 }
 0x116   : > { %v1905_v30 = vld [vmem:[#allocation3 + $0x10] sm:$0xf]  ;;  %v1906_v34 = vld [vmem:[#allocation3 + $0x14] sm:$0x1]  ;;  %1849 = vmatmul.bf16.gmra.mxu3 %v3224_v29  ;;  %v1427_v7 = vpop.f32.mrf.mxu2  ;;  %v1198_v63 = vadd.f32 %v1174_v50, %v817_v45  ;;  %v1974_v15 = vshrl.u32 %v1907_v60, 16  ;;  %v2344_v32 = vsel %vm3573_vm14, %v3101_v31, %v2343_v27  ;;  %v1983_v40 = vshll.u32 %v3894_v21, 16 }
 0x117   : > { %v2336_v35 = vrot.slane %v1905_v30, 5  ;;  %v1959_v9 = vshll.u32 %v1905_v30, 16  ;;  %v1963_v38 = vshrl.u32 %v1905_v30, 16  ;;  %v2339_v1 = vrot.slane %v1906_v34, 5  ;;  %v796_v47 = vpop.f32.mrf.mxu3  ;;  %382 = vst [vmem:[#allocation3 + $0x44] sm:$0x1] %v381_v48 }
 0x118   : > { %v1969_v44 = vshll.u32 %v1906_v34, 16  ;;  %v1571_v55 = vsel %vm3407_vm7, %v1563_v14, %v1570_v41  ;;  %v1681_v56 = vsel %vm3361_vm2, %v1572_v42, %v1680_v25  ;;  %v1482_v10 = vpack.c.bf16 %v1466_v16, %v1466_v16 }
 0x119   : > { %v2337_v51 = vsel %vm3573_vm14, %v3100_v3, %v2336_v35  ;;  %v2338_v43 = vrot.slane %v2336_v35, 4  ;;  %v1961_v52 = vrot.slane %v1959_v9, 5  ;;  %v1965_v53 = vrot.slane %v1963_v38, 4  ;;  %1679 = vst [vmem:[#allocation3 + $0x34] sm:$0xf] %v1571_v55 }
 0x11a   : > { %v2402_v8 = vunpack.c.l.b16 %v2337_v51  ;;  %1682 = vst [vmem:[#allocation3 + $0x38] sm:$0x1] %v1681_v56  ;;  %v1971_v13 = vrot.slane %v1969_v44, 5  ;;  %v1574_v19 = vshrl.u32 %v1482_v10, 16  ;;  %v1577_v28 = vshll.u32 %v1482_v10, 16 }
 0x11b   : > { %v2340_v0 = vsel %vm3573_vm14, %v2338_v43, %v2339_v1  ;;  %v1966_v59 = vor.u32 %v1965_v53, %v1961_v52  ;;  %v3913_v12 = vsel %vm3513_vm11, %v1957_v58, %v1961_v52  ;;  %v1451_v23 = vadd.f32 %v1427_v7, %v1198_v63  ;;  %v1683_v9 = vld [vmem:[#allocation3 + $0x3c] sm:$0xf]  ;;  %v359_v1 = vld [vmem:[#allocation3 + $0x48] sm:$0x1]  ;;  %v383_v7 = vld [vmem:[#allocation3 + $0x50] sm:$0x1] }
 0x11c   : > { %v2403_v17 = vunpack.c.l.b16 %v2340_v0  ;;  %v2152_v18 = vunpack.c.l.b16 %v3913_v12  ;;  %v1976_v3 = vrot.slane %v1974_v15, 4  ;;  %v1977_v25 = vshll.u32 %v1907_v60, 16  ;;  %v3225_v58 = vld [vmem:[#allocation3 + $0x18] sm:$0xff]  ;;  %v1910_v15 = vld [vmem:[#allocation3 + $0x24] sm:$0xf] }
 0x11d   : > { %v1967_v11 = vrot.slane %v1966_v59, 4  ;;  %v1177_v20 = vpop.f32.mrf.mxu1  ;;  %v1576_v30 = vrot.slane %v1574_v19, 7  ;;  %v1987_v34 = vshrl.u32 %v3894_v21, 16  ;;  %v1467_v38 = vmax.f32 %v1451_v23, 0.0 }
 0x11e   : > { %v2417_v57 = vpack.c.b16 %v2403_v17, %v2402_v8  ;;  %v1979_v39 = vrot.slane %v1977_v25, 5  ;;  %v818_v50 = vadd.f32 %v3778_v36, %v796_v47  ;;  %v2347_v42 = vsel %vm3573_vm14, %v2345_v49, %v2346_v5  ;;  %v1430_v43 = vpop.f32.mrf.mxu2  ;;  %v1687_v49 = vld [vmem:[#allocation3 + $0x44] sm:$0x1] }
 0x11f   : > { %v3921_v61 = vsel %vm3513_vm11, %v1967_v11, %v1971_v13  ;;  %v798_v29 = vpop.f32.mrf.mxu3  ;;  %v1579_v41 = vor.u32 %v1577_v28, %v1576_v30  ;;  %v1985_v44 = vrot.slane %v1983_v40, 5  ;;  %v1989_v51 = vrot.slane %v1987_v34, 4  ;;  %v3262_v13 = vld [vmem:[%s4161_s5 + $0x38] sm:$0xff]  ;;  %v1912_v34 = vld [vmem:[#allocation3 + $0x2c] sm:$0x1] }
 0x120   : > { %v2153_v14 = vunpack.c.l.b16 %v3921_v61  ;;  %v1483_v52 = vpack.c.bf16 %v1467_v38, %v1467_v38  ;;  %v1980_v27 = vor.u32 %v1979_v39, %v1976_v3  ;;  %v1993_v53 = vshll.u32 %v3899_v46, 16  ;;  %2669 = vmatpush.bf16.msrb.mxu2 %v3262_v13  ;;  %v2298_v39 = vld [vmem:[#allocation3 + $0x24] sm:$0xe] }
 0x121   : > { %2493 = vmatmul.bf16.gmra.mxu1 %v2417_v57  ;;  %v1199_v54 = vadd.f32 %v1177_v20, %v818_v50  ;;  %v1684_v21 = vsel %vm3413_vm8, %v1579_v41, %v1683_v9  ;;  %v1990_v55 = vor.u32 %v1989_v51, %v1985_v44  ;;  %v360_v47 = vsel %vm3361_vm2, 0, %v359_v1  ;;  %v3947_v20 = vld [vmem:[#allocation3 + $0x28] sm:$0xf] }
 0x122   : > { %v2167_v35 = vpack.c.b16 %v2153_v14, %v2152_v18  ;;  %v819_v56 = vadd.f32 %v3778_v36, %v798_v29  ;;  %1685 = vst [vmem:[#allocation3 + $0x3c] sm:$0xf] %v1684_v21  ;;  %v1582_v45 = vshrl.u32 %v1483_v52, 16  ;;  %v1585_v60 = vshll.u32 %v1483_v52, 16 }
 0x123   : > { %v1452_v0 = vadd.f32 %v1430_v43, %v1199_v54  ;;  %v1580_v59 = vrot.slane %v1576_v30, 4  ;;  %v2404_v16 = vunpack.c.l.b16 %v2344_v32  ;;  %v2405_v5 = vunpack.c.l.b16 %v2347_v42  ;;  %361 = vst [vmem:[#allocation3 + $0x48] sm:$0x1] %v360_v47 }
 0x124   : > { %v1981_v46 = vrot.slane %v1980_v27, 4  ;;  %v1584_v8 = vrot.slane %v1582_v45, 7  ;;  %v1991_v17 = vrot.slane %v1990_v55, 4  ;;  %v1995_v31 = vrot.slane %v1993_v53, 5  ;;  %v362_v27 = vld [vmem:[#allocation3 + $0x54] sm:$0x1] }
 0x125   : > { %2243 = vmatmul.bf16.gmra.mxu0 %v2167_v35  ;;  %v1179_v6 = vpop.f32.mrf.mxu1  ;;  %v1468_v11 = vmax.f32 %v1452_v0, 0.0  ;;  %v2418_v18 = vpack.c.b16 %v2405_v5, %v2404_v16  ;;  %v384_v14 = vsel %vm3368_vm4, 0, %v383_v7  ;;  %v2350_v30 = vrot.slane %v3947_v20, 5 }
 0x126   : > { %1854 = vmatmul.bf16.gmra.mxu3 %v3225_v58  ;;  %v1200_v57 = vadd.f32 %v1179_v6, %v819_v56  ;;  %v1587_v63 = vor.u32 %v1585_v60, %v1584_v8  ;;  %v1589_v48 = vrot.slane %v1584_v8, 4  ;;  %v3945_v19 = vsel %vm3513_vm11, %v1981_v46, %v1985_v44  ;;  %v1432_v23 = vpop.f32.mrf.mxu2  ;;  %385 = vst [vmem:[#allocation3 + $0x50] sm:$0x1] %v384_v14  ;;  %v3261_v60 = vld [vmem:[%s4161_s5 + $0x30] sm:$0xff]  ;;  %v386_v6 = vld [vmem:[#allocation3 + $0x5c] sm:$0x1] }
 0x127   : > { %v801_v10 = vpop.f32.mrf.mxu3  ;;  %v1484_v28 = vpack.c.bf16 %v1468_v11, %v1468_v11  ;;  %v3957_v29 = vsel %vm3513_vm11, %v1991_v17, %v1995_v31  ;;  %v1998_v9 = vshrl.u32 %v1910_v15, 16  ;;  %v2154_v38 = vunpack.c.l.b16 %v3945_v19  ;;  %2670 = vmatpush.bf16.msrb.mxu2 %v3261_v60 }
 0x128   : > { %v1588_v3 = vsel %vm3407_vm7, %v1580_v59, %v1587_v63  ;;  %v1688_v25 = vsel %vm3361_vm2, %v1589_v48, %v1687_v49  ;;  %v1453_v35 = vadd.f32 %v1432_v23, %v1200_v57  ;;  %v2001_v50 = vshll.u32 %v1910_v15, 16 }
 0x129   : > { %1686 = vst [vmem:[#allocation3 + $0x40] sm:$0xf] %v1588_v3  ;;  %v1591_v32 = vshrl.u32 %v1484_v28, 16  ;;  %v1594_v40 = vshll.u32 %v1484_v28, 16  ;;  %v2007_v1 = vshll.u32 %v3947_v20, 16  ;;  %v820_v41 = vadd.f32 %v3778_v36, %v801_v10  ;;  %v3226_v28 = vld [vmem:[#allocation3 + $0x24] sm:$0xff] }
 0x12a   : > { %1689 = vst [vmem:[#allocation3 + $0x44] sm:$0x1] %v1688_v25  ;;  %v2155_v42 = vunpack.c.l.b16 %v3957_v29  ;;  %v1469_v51 = vmax.f32 %v1453_v35, 0.0  ;;  %v2011_v43 = vshrl.u32 %v3947_v20, 16  ;;  %v1690_v53 = vld [vmem:[#allocation3 + $0x48] sm:$0xf] }
 0x12b   : > { %v1593_v44 = vrot.slane %v1591_v32, 7  ;;  %v2000_v54 = vrot.slane %v1998_v9, 4  ;;  %v2003_v21 = vrot.slane %v2001_v50, 5  ;;  %v2009_v55 = vrot.slane %v2007_v1, 5  ;;  %v3260_v9 = vld [vmem:[%s4161_s5 + $0x28] sm:$0xff] }
 0x12c   : > { %v1485_v58 = vpack.c.bf16 %v1469_v51, %v1469_v51  ;;  %v2013_v45 = vrot.slane %v2011_v43, 4  ;;  %v3102_v0 = vrot.slane %v2298_v39, 9  ;;  %v2352_v59 = vrot.slane %v2350_v30, 4  ;;  %v1913_v50 = vld [vmem:[#allocation3 + $0x30] sm:$0xf]  ;;  %2671 = vmatpush.bf16.msrb.mxu2 %v3260_v9 }
 0x12d   : > { %v1182_v52 = vpop.f32.mrf.mxu1  ;;  %v1596_v56 = vor.u32 %v1594_v40, %v1593_v44  ;;  %v2353_v16 = vrot.slane %v1912_v34, 5  ;;  %v363_v5 = vsel %vm3361_vm2, 0, %v362_v27  ;;  %v2168_v7 = vpack.c.b16 %v2155_v42, %v2154_v38  ;;  %v1694_v20 = vld [vmem:[#allocation3 + $0x50] sm:$0x1]  ;;  %v1914_v42 = vld [vmem:[#allocation3 + $0x34] sm:$0xf] }
 0x12e   : > { %v1201_v47 = vadd.f32 %v1182_v52, %v820_v41  ;;  %v1599_v17 = vshrl.u32 %v1485_v58, 16  ;;  %v1602_v31 = vshll.u32 %v1485_v58, 16  ;;  %364 = vst [vmem:[#allocation3 + $0x54] sm:$0x1] %v363_v5  ;;  %v1435_v11 = vpop.f32.mrf.mxu2  ;;  %v2004_v13 = vor.u32 %v2003_v21, %v2000_v54  ;;  %v1916_v9 = vld [vmem:[#allocation3 + $0x3c] sm:$0xf] }
 0x12f   : > { %v803_v46 = vpop.f32.mrf.mxu3  ;;  %v1691_v8 = vsel %vm3413_vm8, %v1596_v56, %v1690_v53  ;;  %v2014_v10 = vor.u32 %v2013_v45, %v2009_v55  ;;  %v2017_v49 = vshll.u32 %v1912_v34, 16  ;;  %v1597_v63 = vrot.slane %v1593_v44, 4 }
 0x130   : > { %1692 = vst [vmem:[#allocation3 + $0x48] sm:$0xf] %v1691_v8  ;;  %v1454_v57 = vadd.f32 %v1435_v11, %v1201_v47  ;;  %v1601_v48 = vrot.slane %v1599_v17, 7  ;;  %v821_v15 = vadd.f32 %v3778_v36, %v803_v46  ;;  %v2351_v23 = vsel %vm3573_vm14, %v3102_v0, %v2350_v30 }
 0x131   : > { %2498 = vmatmul.bf16.gmra.mxu1 %v2418_v18  ;;  %v387_v18 = vsel %vm3368_vm4, 0, %v386_v6  ;;  %v2354_v3 = vsel %vm3573_vm14, %v2352_v59, %v2353_v16  ;;  %v2005_v34 = vrot.slane %v2004_v13, 4  ;;  %v2015_v36 = vrot.slane %v2014_v10, 4  ;;  %v1915_v6 = vld [vmem:[#allocation3 + $0x38] sm:$0x1] }
 0x132   : > { %v1470_v14 = vmax.f32 %v1454_v57, 0.0  ;;  %388 = vst [vmem:[#allocation3 + $0x5c] sm:$0x1] %v387_v18  ;;  %v1604_v25 = vor.u32 %v1602_v31, %v1601_v48  ;;  %v1606_v32 = vrot.slane %v1601_v48, 4  ;;  %v2019_v35 = vrot.slane %v2017_v49, 5 }
 0x133   : > { %v2406_v44 = vunpack.c.l.b16 %v2351_v23  ;;  %v2407_v51 = vunpack.c.l.b16 %v2354_v3  ;;  %v3988_v52 = vsel %vm3513_vm11, %v2005_v34, %v2009_v55  ;;  %v2022_v47 = vshrl.u32 %v1913_v50, 16  ;;  %v3227_v3 = vld [vmem:[#allocation3 + $0x30] sm:$0xff] }
 0x134   : > { %v1486_v4 = vpack.c.bf16 %v1470_v14, %v1470_v14  ;;  %v1605_v38 = vsel %vm3407_vm7, %v1597_v63, %v1604_v25  ;;  %v1695_v30 = vsel %vm3361_vm2, %v1606_v32, %v1694_v20  ;;  %v3992_v27 = vsel %vm3513_vm11, %v2015_v36, %v2019_v35 }
 0x135   : > { %2248 = vmatmul.bf16.gmra.mxu0 %v2168_v7  ;;  %v1184_v40 = vpop.f32.mrf.mxu1  ;;  %1693 = vst [vmem:[#allocation3 + $0x4c] sm:$0xf] %v1605_v38  ;;  %v1697_v21 = vld [vmem:[#allocation3 + $0x54] sm:$0xf]  ;;  %v2025_v56 = vshll.u32 %v1913_v50, 16  ;;  %v2031_v58 = vshll.u32 %v1914_v42, 16  ;;  %v2419_v59 = vpack.c.b16 %v2407_v51, %v2406_v44  ;;  %v2156_v5 = vunpack.c.l.b16 %v3988_v52 }
 0x136   : > { %1859 = vmatmul.bf16.gmra.mxu3 %v3226_v28  ;;  %v1202_v39 = vadd.f32 %v1184_v40, %v821_v15  ;;  %v1608_v1 = vshrl.u32 %v1486_v4, 16  ;;  %v1611_v41 = vshll.u32 %v1486_v4, 16  ;;  %1696 = vst [vmem:[#allocation3 + $0x50] sm:$0x1] %v1695_v30  ;;  %v1437_v43 = vpop.f32.mrf.mxu2  ;;  %v2035_v45 = vshrl.u32 %v1914_v42, 16  ;;  %v3259_v40 = vld [vmem:[%s4161_s5 + $0x20] sm:$0xff] }
 0x137   : > { %v2357_v16 = vrot.slane %v1914_v42, 5  ;;  %v2157_v55 = vunpack.c.l.b16 %v3992_v27  ;;  %v2299_v7 = vld [vmem:[#allocation3 + $0x30] sm:$0xe]  ;;  %v2024_v17 = vrot.slane %v2022_v47, 4  ;;  %v2027_v31 = vrot.slane %v2025_v56, 5  ;;  %2672 = vmatpush.bf16.msrb.mxu2 %v3259_v40 }
 0x138   : > { %v1610_v53 = vrot.slane %v1608_v1, 7  ;;  %v1455_v54 = vadd.f32 %v1437_v43, %v1202_v39  ;;  %v2033_v11 = vrot.slane %v2031_v58, 5  ;;  %v2037_v13 = vrot.slane %v2035_v45, 4  ;;  %v1917_v50 = vld [vmem:[#allocation3 + $0x40] sm:$0xf] }
 0x139   : > { %v3103_v57 = vrot.slane %v2299_v7, 9  ;;  %v2360_v63 = vrot.slane %v1915_v6, 5  ;;  %v2169_v48 = vpack.c.b16 %v2157_v55, %v2156_v5  ;;  %v2359_v18 = vrot.slane %v2357_v16, 4  ;;  %v1701_v20 = vld [vmem:[#allocation3 + $0x5c] sm:$0x1] }
 0x13a   : > { %v1613_v60 = vor.u32 %v1611_v41, %v1610_v53  ;;  %v1471_v0 = vmax.f32 %v1455_v54, 0.0  ;;  %v1614_v15 = vrot.slane %v1610_v53, 4  ;;  %v2028_v26 = vor.u32 %v2027_v31, %v2024_v17  ;;  %v2300_v56 = vld [vmem:[#allocation3 + $0x3c] sm:$0xe] }
 0x13b   : > { %v2038_v14 = vor.u32 %v2037_v13, %v2033_v11  ;;  %v2041_v23 = vshll.u32 %v1915_v6, 16  ;;  %v2358_v34 = vsel %vm3573_vm14, %v3103_v57, %v2357_v16  ;;  %v2361_v36 = vsel %vm3573_vm14, %v2359_v18, %v2360_v63  ;;  %v3228_v17 = vld [vmem:[#allocation3 + $0x3c] sm:$0xff]  ;;  %v1919_v63 = vld [vmem:[#allocation3 + $0x48] sm:$0xf] }
 0x13c   : > { %v1698_v46 = vsel %vm3413_vm8, %v1613_v60, %v1697_v21  ;;  %v1487_v8 = vpack.c.bf16 %v1471_v0, %v1471_v0  ;;  %v2029_v38 = vrot.slane %v2028_v26, 4  ;;  %v2408_v1 = vunpack.c.l.b16 %v2358_v34  ;;  %v1918_v60 = vld [vmem:[#allocation3 + $0x44] sm:$0x1]  ;;  %v3258_v31 = vld [vmem:[%s4161_s5 + $0x18] sm:$0xff] }
 0x13d   : > { %1699 = vst [vmem:[#allocation3 + $0x54] sm:$0xf] %v1698_v46  ;;  %v2039_v30 = vrot.slane %v2038_v14, 4  ;;  %v2043_v39 = vrot.slane %v2041_v23, 5  ;;  %v2409_v41 = vunpack.c.l.b16 %v2361_v36  ;;  %v2046_v42 = vshrl.u32 %v1916_v9, 16  ;;  %2673 = vmatpush.bf16.msrb.mxu2 %v3258_v31 }
 0x13e   : > { %v1616_v10 = vshrl.u32 %v1487_v8, 16  ;;  %v1619_v49 = vshll.u32 %v1487_v8, 16  ;;  %v2049_v44 = vshll.u32 %v1916_v9, 16  ;;  %v4011_v51 = vsel %vm3513_vm11, %v2029_v38, %v2033_v11  ;;  %v1921_v34 = vld [vmem:[#allocation3 + $0x50] sm:$0x1] }
 0x13f   : > { %v4015_v2 = vsel %vm3513_vm11, %v2039_v30, %v2043_v39  ;;  %v2055_v22 = vshll.u32 %v1917_v50, 16  ;;  %v2059_v43 = vshrl.u32 %v1917_v50, 16  ;;  %v2420_v53 = vpack.c.b16 %v2409_v41, %v2408_v1  ;;  %v2301_v36 = vld [vmem:[#allocation3 + $0x48] sm:$0xe]  ;;  %v3257_v39 = vld [vmem:[%s4161_s5 + $0x10] sm:$0xff] }
 0x140   : > { %v1618_v28 = vrot.slane %v1616_v10, 7  ;;  %v2364_v54 = vrot.slane %v1917_v50, 5  ;;  %v2158_v21 = vunpack.c.l.b16 %v4011_v51  ;;  %v2159_v47 = vunpack.c.l.b16 %v4015_v2 }
 0x141   : > { %2503 = vmatmul.bf16.gmra.mxu1 %v2419_v59  ;;  %v2048_v58 = vrot.slane %v2046_v42, 4  ;;  %v2051_v45 = vrot.slane %v2049_v44, 5  ;;  %v2057_v0 = vrot.slane %v2055_v22, 5  ;;  %v2061_v59 = vrot.slane %v2059_v43, 4  ;;  %2674 = vmatpush.bf16.msrb.mxu2 %v3257_v39 }
 0x142   : > { %v1621_v25 = vor.u32 %v1619_v49, %v1618_v28  ;;  %v1623_v32 = vrot.slane %v1618_v28, 4  ;;  %v3104_v16 = vrot.slane %v2300_v56, 9  ;;  %v2170_v5 = vpack.c.b16 %v2159_v47, %v2158_v21 }
 0x143   : > { %v2366_v55 = vrot.slane %v2364_v54, 4  ;;  %v2367_v46 = vrot.slane %v1918_v60, 5  ;;  %v2052_v6 = vor.u32 %v2051_v45, %v2048_v58  ;;  %v2062_v7 = vor.u32 %v2061_v59, %v2057_v0 }
 0x144   : > { %v1622_v35 = vsel %vm3407_vm7, %v1614_v15, %v1621_v25  ;;  %v1702_v4 = vsel %vm3361_vm2, %v1623_v32, %v1701_v20  ;;  %v2065_v8 = vshll.u32 %v1918_v60, 16  ;;  %v2365_v11 = vsel %vm3573_vm14, %v3104_v16, %v2364_v54  ;;  %v1922_v45 = vld [vmem:[#allocation3 + $0x54] sm:$0xf] }
 0x145   : > { %2253 = vmatmul.bf16.gmra.mxu0 %v2169_v48  ;;  %1700 = vst [vmem:[#allocation3 + $0x58] sm:$0xf] %v1622_v35  ;;  %v2368_v13 = vsel %vm3573_vm14, %v2366_v55, %v2367_v46  ;;  %v2053_v10 = vrot.slane %v2052_v6, 4  ;;  %v2063_v49 = vrot.slane %v2062_v7, 4  ;;  %v1920_v48 = vld [vmem:[#allocation3 + $0x4c] sm:$0xf]  ;;  %v2410_v15 = vunpack.c.l.b16 %v2365_v11 }
 0x146   : > { %1864 = vmatmul.bf16.gmra.mxu3 %v3227_v3  ;;  %1703 = vst [vmem:[#allocation3 + $0x5c] sm:$0x1] %v1702_v4  ;;  %v2067_v57 = vrot.slane %v2065_v8, 5  ;;  %v2411_v18 = vunpack.c.l.b16 %v2368_v13  ;;  %v2070_v20 = vshrl.u32 %v1919_v63, 16  ;;  %v2073_v14 = vshll.u32 %v1919_v63, 16  ;;  %v3256_v55 = vld [vmem:[%s4161_s5 + $0x8] sm:$0xff] }
 0x147   : > { %v4028_v28 = vsel %vm3513_vm11, %v2053_v10, %v2057_v0  ;;  %v2079_v23 = vshll.u32 %v1920_v48, 16  ;;  %v2083_v3 = vshrl.u32 %v1920_v48, 16  ;;  %v2371_v35 = vrot.slane %v1920_v48, 5  ;;  %2675 = vmatpush.bf16.msrb.mxu2 %v3256_v55 }
 0x148   : > { %v4032_v26 = vsel %vm3513_vm11, %v2063_v49, %v2067_v57  ;;  %v2421_v25 = vpack.c.b16 %v2411_v18, %v2410_v15  ;;  %v2160_v32 = vunpack.c.l.b16 %v4028_v28  ;;  %v2072_v4 = vrot.slane %v2070_v20, 4  ;;  %v2302_v49 = vld [vmem:[#allocation3 + $0x54] sm:$0xe] }
 0x149   : > { %v2161_v40 = vunpack.c.l.b16 %v4032_v26  ;;  %v2075_v9 = vrot.slane %v2073_v14, 5  ;;  %v2081_v38 = vrot.slane %v2079_v23, 5  ;;  %v2085_v30 = vrot.slane %v2083_v3, 4 }
 0x14a   : > { %v3105_v1 = vrot.slane %v2301_v36, 9  ;;  %v2373_v41 = vrot.slane %v2371_v35, 4  ;;  %v2374_v42 = vrot.slane %v1921_v34, 5  ;;  %v2089_v43 = vshll.u32 %v1921_v34, 16 }
 0x14b   : > { %v2171_v50 = vpack.c.b16 %v2161_v40, %v2160_v32  ;;  %v2076_v44 = vor.u32 %v2075_v9, %v2072_v4  ;;  %v2086_v22 = vor.u32 %v2085_v30, %v2081_v38  ;;  %v2094_v16 = vshrl.u32 %v1922_v45, 16 }
 0x14c   : > { %v2372_v54 = vsel %vm3573_vm14, %v3105_v1, %v2371_v35  ;;  %v2375_v21 = vsel %vm3573_vm14, %v2373_v41, %v2374_v42  ;;  %v2091_v58 = vrot.slane %v2089_v43, 5  ;;  %v1923_v60 = vld [vmem:[#allocation3 + $0x58] sm:$0xf]  ;;  %v3106_v20 = vrot.slane %v2302_v49, 9 }
 0x14d   : > { %v2077_v47 = vrot.slane %v2076_v44, 4  ;;  %v2087_v56 = vrot.slane %v2086_v22, 4  ;;  %v2412_v0 = vunpack.c.l.b16 %v2372_v54  ;;  %v2413_v59 = vunpack.c.l.b16 %v2375_v21  ;;  %v1924_v13 = vld [vmem:[#allocation3 + $0x5c] sm:$0x1]  ;;  %v3230_v40 = vld [vmem:[#allocation3 + $0x54] sm:$0xff] }
 0x14e   : > { %v2103_v7 = vshll.u32 %v1923_v60, 16  ;;  %v2107_v8 = vshrl.u32 %v1923_v60, 16  ;;  %v2378_v10 = vrot.slane %v1923_v60, 5  ;;  %v2096_v57 = vrot.slane %v2094_v16, 4 }
 0x14f   : > { %v4048_v46 = vsel %vm3513_vm11, %v2077_v47, %v2081_v38  ;;  %v4052_v6 = vsel %vm3513_vm11, %v2087_v56, %v2091_v58  ;;  %v2381_v23 = vrot.slane %v1924_v13, 5  ;;  %v2113_v32 = vshll.u32 %v1924_v13, 16  ;;  %v3255_v38 = vld [vmem:[%s4161_s5] sm:$0xff] }
 0x150   : > { %v2162_v31 = vunpack.c.l.b16 %v4048_v46  ;;  %v2163_v11 = vunpack.c.l.b16 %v4052_v6  ;;  %v2105_v48 = vrot.slane %v2103_v7, 5  ;;  %v2109_v15 = vrot.slane %v2107_v8, 4  ;;  %2676 = vmatpush.bf16.msrb.mxu2 %v3255_v38 }
 0x151   : > { %2508 = vmatmul.bf16.gmra.mxu1 %v2420_v53  ;;  %v3229_v53 = vld [vmem:[#allocation3 + $0x48] sm:$0xff]  ;;  %v2380_v14 = vrot.slane %v2378_v10, 4  ;;  %v2379_v34 = vsel %vm3573_vm14, %v3106_v20, %v2378_v10  ;;  %v2115_v9 = vrot.slane %v2113_v32, 5  ;;  %v2561_v7 = vunpack.c.l.bf16 %v3879_v24 }
 0x152   : > { %v2172_v18 = vpack.c.b16 %v2163_v11, %v2162_v31  ;;  %v2414_v30 = vunpack.c.l.b16 %v2379_v34  ;;  %v2563_v32 = vunpack.c.l.bf16 %v3913_v12 }
 0x153   : > { %v2382_v36 = vsel %vm3573_vm14, %v2380_v14, %v2381_v23 }
 0x154   : > { %v2415_v39 = vunpack.c.l.b16 %v2382_v36 }
 0x155   : > { %2258 = vmatmul.bf16.gmra.mxu0 %v2170_v5  ;;  %v2097_v5 = vshll.u32 %v1922_v45, 16 }
 0x156   : > { %1869 = vmatmul.bf16.gmra.mxu3 %v3228_v17  ;;  %v2422_v17 = vpack.c.b16 %v2413_v59, %v2412_v0  ;;  %v2423_v37 = vpack.c.b16 %v2415_v39, %v2414_v30 }
 0x157   : > { %v2099_v63 = vrot.slane %v2097_v5, 5 }
 0x159   : > { %v2100_v3 = vor.u32 %v2099_v63, %v2096_v57 }
 0x15b   : > { %v2101_v35 = vrot.slane %v2100_v3, 4 }
 0x161   : > { %2513 = vmatmul.bf16.gmra.mxu1 %v2421_v25  ;;  %v2110_v25 = vor.u32 %v2109_v15, %v2105_v48 }
 0x163   : > { %v2111_v4 = vrot.slane %v2110_v25, 4 }
 0x165   : > { %2263 = vmatmul.bf16.gmra.mxu0 %v2171_v50  ;;  %v4065_v50 = vsel %vm3513_vm11, %v2101_v35, %v2105_v48  ;;  %v4069_v1 = vsel %vm3513_vm11, %v2111_v4, %v2115_v9 }
 0x166   : > { %1874 = vmatmul.bf16.gmra.mxu3 %v3229_v53  ;;  %v2164_v41 = vunpack.c.l.b16 %v4065_v50  ;;  %v2165_v42 = vunpack.c.l.b16 %v4069_v1  ;;  %v4076_v53 = vld [vmem:[%s4160_s4] ss:$0 sm:$0xff] }
 0x168   : > { %v2173_v44 = vpack.c.b16 %v2165_v42, %v2164_v41 }
 0x171   : > { %2518 = vmatmul.bf16.gmra.mxu1 %v2422_v17  ;;  %v2562_v17 = vunpack.c.l.bf16 %v3888_v62 }
 0x175   : > { %2268 = vmatmul.bf16.gmra.mxu0 %v2172_v18 }
 0x176   : > { %1879 = vmatmul.bf16.gmra.mxu3 %v3230_v40  ;;  %v2564_v40 = vunpack.c.l.bf16 %v3921_v61 }
 0x181   : > { %2523 = vmatmul.bf16.gmra.mxu1 %v2423_v37 }
 0x185   : > { %2273 = vmatmul.bf16.gmra.mxu0 %v2173_v44 }
 0x189   : > { %v1845_v22 = vpop.f32.mrf.mxu3 }
 0x18a   : > { %v1885_v33 = vadd.f32 %v4076_v53, %v1845_v22 }
 0x18e   : > { %v2489_v43 = vpop.f32.mrf.mxu1 }
 0x191   : > { %v1847_v21 = vpop.f32.mrf.mxu3 }
 0x192   : > { %v2239_v54 = vpop.f32.mrf.mxu0  ;;  %v1886_v45 = vadd.f32 %v4076_v53, %v1847_v21  ;;  %v2565_v21 = vunpack.c.l.bf16 %v3945_v19 }
 0x193   : > { %v2279_v47 = vadd.f32 %v2239_v54, %v1885_v33  ;;  %v2566_v33 = vunpack.c.l.bf16 %v3957_v29 }
 0x195   : > { %v2529_v58 = vadd.f32 %v2489_v43, %v2279_v47 }
 0x196   : > { %v2491_v56 = vpop.f32.mrf.mxu1 }
 0x197   : > { %v2545_v16 = vmax.f32 %v2529_v58, 0.0 }
 0x199   : > { %v1850_v0 = vpop.f32.mrf.mxu3  ;;  %v2577_v31 = vadd.f32 %v2561_v7, %v2545_v16 }
 0x19a   : > { %v2241_v60 = vpop.f32.mrf.mxu0  ;;  %v1887_v49 = vadd.f32 %v4076_v53, %v1850_v0 }
 0x19b   : > { %v2280_v59 = vadd.f32 %v2241_v60, %v1886_v45 }
 0x19d   : > { %v2530_v5 = vadd.f32 %v2491_v56, %v2280_v59 }
 0x19e   : > { %v2494_v55 = vpop.f32.mrf.mxu1 }
 0x19f   : > { %v2546_v8 = vmax.f32 %v2530_v5, 0.0 }
 0x1a1   : > { %v2578_v11 = vadd.f32 %v2562_v17, %v2546_v8  ;;  %v1852_v10 = vpop.f32.mrf.mxu3 }
 0x1a2   : > { %v2244_v13 = vpop.f32.mrf.mxu0  ;;  %v1888_v18 = vadd.f32 %v4076_v53, %v1852_v10  ;;  %v2568_v10 = vunpack.c.l.bf16 %v3992_v27 }
 0x1a3   : > { %v2593_v57 = vpack.c.bf16 %v2578_v11, %v2577_v31  ;;  %v2281_v63 = vadd.f32 %v2244_v13, %v1887_v49  ;;  %v2567_v13 = vunpack.c.l.bf16 %v3988_v52 }
 0x1a5   : > { %2677 = vmatmul.bf16.vlgmr.msrb.gmra.mxu2 %v2593_v57  ;;  %v2531_v15 = vadd.f32 %v2494_v55, %v2281_v63 }
 0x1a6   : > { %v2496_v48 = vpop.f32.mrf.mxu1 }
 0x1a7   : > { %v2547_v24 = vmax.f32 %v2531_v15, 0.0 }
 0x1a9   : > { %v1855_v14 = vpop.f32.mrf.mxu3  ;;  %v2579_v34 = vadd.f32 %v2563_v32, %v2547_v24 }
 0x1aa   : > { %v2246_v20 = vpop.f32.mrf.mxu0  ;;  %v1889_v9 = vadd.f32 %v4076_v53, %v1855_v14 }
 0x1ab   : > { %v2282_v23 = vadd.f32 %v2246_v20, %v1888_v18 }
 0x1ad   : > { %v2532_v3 = vadd.f32 %v2496_v48, %v2282_v23 }
 0x1ae   : > { %v2499_v25 = vpop.f32.mrf.mxu1 }
 0x1af   : > { %v2548_v62 = vmax.f32 %v2532_v3, 0.0 }
 0x1b1   : > { %v2580_v36 = vadd.f32 %v2564_v40, %v2548_v62  ;;  %v1857_v4 = vpop.f32.mrf.mxu3 }
 0x1b2   : > { %v2249_v35 = vpop.f32.mrf.mxu0  ;;  %v1890_v41 = vadd.f32 %v4076_v53, %v1857_v4 }
 0x1b3   : > { %v2594_v38 = vpack.c.bf16 %v2580_v36, %v2579_v34  ;;  %v2283_v30 = vadd.f32 %v2249_v35, %v1889_v9  ;;  %v2569_v34 = vunpack.c.l.bf16 %v4011_v51  ;;  %v2570_v36 = vunpack.c.l.bf16 %v4015_v2 }
 0x1b5   : > { %2682 = vmatmul.bf16.gmra.mxu2 %v2594_v38  ;;  %v2533_v37 = vadd.f32 %v2499_v25, %v2283_v30 }
 0x1b6   : > { %v2501_v39 = vpop.f32.mrf.mxu1 }
 0x1b7   : > { %v2549_v43 = vmax.f32 %v2533_v37, 0.0 }
 0x1b9   : > { %v1860_v44 = vpop.f32.mrf.mxu3  ;;  %v2581_v47 = vadd.f32 %v2565_v21, %v2549_v43  ;;  %v2571_v21 = vunpack.c.l.bf16 %v4028_v28 }
 0x1ba   : > { %v2251_v42 = vpop.f32.mrf.mxu0  ;;  %v1891_v60 = vadd.f32 %v4076_v53, %v1860_v44 }
 0x1bb   : > { %v2284_v22 = vadd.f32 %v2251_v42, %v1890_v41 }
 0x1bd   : > { %v2534_v12 = vadd.f32 %v2501_v39, %v2284_v22 }
 0x1be   : > { %v2504_v54 = vpop.f32.mrf.mxu1 }
 0x1bf   : > { %v2550_v61 = vmax.f32 %v2534_v12, 0.0 }
 0x1c1   : > { %v2582_v56 = vadd.f32 %v2566_v33, %v2550_v61  ;;  %v1862_v45 = vpop.f32.mrf.mxu3  ;;  %v2572_v33 = vunpack.c.l.bf16 %v4032_v26  ;;  %v2573_v26 = vunpack.c.l.bf16 %v4048_v46 }
 0x1c2   : > { %v2254_v58 = vpop.f32.mrf.mxu0  ;;  %v1892_v55 = vadd.f32 %v4076_v53, %v1862_v45 }
 0x1c3   : > { %v2595_v0 = vpack.c.bf16 %v2582_v56, %v2581_v47  ;;  %v2285_v59 = vadd.f32 %v2254_v58, %v1891_v60 }
 0x1c5   : > { %2687 = vmatmul.bf16.gmra.mxu2 %v2595_v0  ;;  %v2535_v5 = vadd.f32 %v2504_v54, %v2285_v59 }
 0x1c6   : > { %v2506_v16 = vpop.f32.mrf.mxu1 }
 0x1c7   : > { %v2551_v31 = vmax.f32 %v2535_v5, 0.0 }
 0x1c9   : > { %v1865_v8 = vpop.f32.mrf.mxu3  ;;  %v2583_v49 = vadd.f32 %v2567_v13, %v2551_v31 }
 0x1ca   : > { %v2256_v7 = vpop.f32.mrf.mxu0  ;;  %v1893_v15 = vadd.f32 %v4076_v53, %v1865_v8 }
 0x1cb   : > { %v2286_v17 = vadd.f32 %v2256_v7, %v1892_v55 }
 0x1cd   : > { %v2536_v19 = vadd.f32 %v2506_v16, %v2286_v17 }
 0x1ce   : > { %v2509_v11 = vpop.f32.mrf.mxu1 }
 0x1cf   : > { %v2552_v29 = vmax.f32 %v2536_v19, 0.0 }
 0x1d1   : > { %v2584_v57 = vadd.f32 %v2568_v10, %v2552_v29  ;;  %v1867_v48 = vpop.f32.mrf.mxu3 }
 0x1d2   : > { %v2259_v63 = vpop.f32.mrf.mxu0  ;;  %v1894_v24 = vadd.f32 %v4076_v53, %v1867_v48 }
 0x1d3   : > { %v2596_v18 = vpack.c.bf16 %v2584_v57, %v2583_v49  ;;  %v2287_v20 = vadd.f32 %v2259_v63, %v1893_v15 }
 0x1d5   : > { %2692 = vmatmul.bf16.gmra.mxu2 %v2596_v18  ;;  %v2537_v23 = vadd.f32 %v2509_v11, %v2287_v20  ;;  %v2574_v11 = vunpack.c.l.bf16 %v4052_v6  ;;  %v2575_v6 = vunpack.c.l.bf16 %v4065_v50 }
 0x1d6   : > { %v2511_v14 = vpop.f32.mrf.mxu1 }
 0x1d7   : > { %v2553_v32 = vmax.f32 %v2537_v23, 0.0 }
 0x1d9   : > { %v1870_v25 = vpop.f32.mrf.mxu3  ;;  %v2585_v35 = vadd.f32 %v2569_v34, %v2553_v32 }
 0x1da   : > { %v2261_v3 = vpop.f32.mrf.mxu0  ;;  %v1895_v30 = vadd.f32 %v4076_v53, %v1870_v25 }
 0x1db   : > { %v2288_v62 = vadd.f32 %v2261_v3, %v1894_v24 }
 0x1dd   : > { %v2538_v52 = vadd.f32 %v2511_v14, %v2288_v62  ;;  %v2576_v62 = vunpack.c.l.bf16 %v4069_v1 }
 0x1de   : > { %v2514_v40 = vpop.f32.mrf.mxu1 }
 0x1df   : > { %v2554_v27 = vmax.f32 %v2538_v52, 0.0 }
 0x1e1   : > { %v2586_v4 = vadd.f32 %v2570_v36, %v2554_v27  ;;  %v1872_v38 = vpop.f32.mrf.mxu3  ;;  %v4113_v27 = vld [vmem:[%s4162_s6] ss:$0 sm:$0xff] }
 0x1e2   : > { %v2264_v9 = vpop.f32.mrf.mxu0  ;;  %v1896_v44 = vadd.f32 %v4076_v53, %v1872_v38 }
 0x1e3   : > { %v2597_v39 = vpack.c.bf16 %v2586_v4, %v2585_v35  ;;  %v2289_v37 = vadd.f32 %v2264_v9, %v1895_v30 }
 0x1e5   : > { %2697 = vmatmul.bf16.gmra.mxu2 %v2597_v39  ;;  %v2539_v42 = vadd.f32 %v2514_v40, %v2289_v37 }
 0x1e6   : > { %v2516_v41 = vpop.f32.mrf.mxu1 }
 0x1e7   : > { %v2555_v54 = vmax.f32 %v2539_v42, 0.0 }
 0x1e9   : > { %v1875_v43 = vpop.f32.mrf.mxu3  ;;  %v2587_v47 = vadd.f32 %v2571_v21, %v2555_v54 }
 0x1ea   : > { %v2266_v22 = vpop.f32.mrf.mxu0  ;;  %v1897_v60 = vadd.f32 %v4076_v53, %v1875_v43 }
 0x1eb   : > { %v2290_v12 = vadd.f32 %v2266_v22, %v1896_v44 }
 0x1ed   : > { %v2540_v51 = vadd.f32 %v2516_v41, %v2290_v12 }
 0x1ee   : > { %v2519_v61 = vpop.f32.mrf.mxu1 }
 0x1ef   : > { %v2556_v2 = vmax.f32 %v2540_v51, 0.0 }
 0x1f1   : > { %v2588_v56 = vadd.f32 %v2572_v33, %v2556_v2  ;;  %v1877_v45 = vpop.f32.mrf.mxu3 }
 0x1f2   : > { %v2269_v58 = vpop.f32.mrf.mxu0  ;;  %v1898_v55 = vadd.f32 %v4076_v53, %v1877_v45 }
 0x1f3   : > { %v2598_v0 = vpack.c.bf16 %v2588_v56, %v2587_v47  ;;  %v2291_v59 = vadd.f32 %v2269_v58, %v1897_v60 }
 0x1f5   : > { %2702 = vmatmul.bf16.gmra.mxu2 %v2598_v0  ;;  %v2541_v5 = vadd.f32 %v2519_v61, %v2291_v59 }
 0x1f6   : > { %v2521_v16 = vpop.f32.mrf.mxu1 }
 0x1f7   : > { %v2557_v31 = vmax.f32 %v2541_v5, 0.0 }
 0x1f9   : > { %v1880_v17 = vpop.f32.mrf.mxu3  ;;  %v2589_v29 = vadd.f32 %v2573_v26, %v2557_v31 }
 0x1fa   : > { %v2271_v7 = vpop.f32.mrf.mxu0  ;;  %v1899_v57 = vadd.f32 %v4076_v53, %v1880_v17 }
 0x1fb   : > { %v2292_v8 = vadd.f32 %v2271_v7, %v1898_v55 }
 0x1fd   : > { %v2542_v28 = vadd.f32 %v2521_v16, %v2292_v8 }
 0x1fe   : > { %v2524_v10 = vpop.f32.mrf.mxu1 }
 0x1ff   : > { %v2558_v19 = vmax.f32 %v2542_v28, 0.0 }
 0x201   : > { %v2590_v13 = vadd.f32 %v2574_v11, %v2558_v19  ;;  %v1882_v15 = vpop.f32.mrf.mxu3 }
 0x202   : > { %v2274_v49 = vpop.f32.mrf.mxu0  ;;  %v1900_v20 = vadd.f32 %v4076_v53, %v1882_v15 }
 0x203   : > { %v2599_v63 = vpack.c.bf16 %v2590_v13, %v2589_v29  ;;  %v2293_v48 = vadd.f32 %v2274_v49, %v1899_v57 }
 0x205   : > { %2707 = vmatmul.bf16.gmra.mxu2 %v2599_v63  ;;  %v2543_v18 = vadd.f32 %v2524_v10, %v2293_v48 }
 0x206   : > { %v2526_v46 = vpop.f32.mrf.mxu1 }
 0x207   : > { %v2559_v24 = vmax.f32 %v2543_v18, 0.0 }
 0x209   : > { %v2591_v32 = vadd.f32 %v2575_v6, %v2559_v24 }
 0x20a   : > { %v2276_v14 = vpop.f32.mrf.mxu0 }
 0x20b   : > { %v2294_v23 = vadd.f32 %v2276_v14, %v1900_v20 }
 0x20d   : > { %v2544_v3 = vadd.f32 %v2526_v46, %v2294_v23 }
 0x20f   : > { %v2560_v25 = vmax.f32 %v2544_v3, 0.0 }
 0x211   : > { %v2592_v52 = vadd.f32 %v2576_v62, %v2560_v25 }
 0x213   : > { %v2600_v40 = vpack.c.bf16 %v2592_v52, %v2591_v32 }
 0x215   : > { %2712 = vmatmul.bf16.gmra.mxu2 %v2600_v40 }
 0x228   : > { %v2678_v53 = vpop.f32.mrf.mxu2 }
 0x229   : > { %v2679_v34 = vadd.f32 %v4113_v27, %v2678_v53 }
 0x22b   : > { %v2718_v50 = vmax.f32 %v2679_v34, 0.0 }
 0x22d   : > { %2734 = vst [vmem:[%s4120_s26] sm:$0xff] %v2718_v50 }
 0x230   : > { %v2680_v1 = vpop.f32.mrf.mxu2 }
 0x231   : > { %v2681_v36 = vadd.f32 %v4113_v27, %v2680_v1 }
 0x233   : > { %v2719_v35 = vmax.f32 %v2681_v36, 0.0 }
 0x235   : > { %2735 = vst [vmem:[%s4120_s26 + $0x8] sm:$0xff] %v2719_v35 }
 0x238   : > { %v2683_v4 = vpop.f32.mrf.mxu2 }
 0x239   : > { %v2684_v9 = vadd.f32 %v4113_v27, %v2683_v4 }
 0x23b   : > { %v2720_v38 = vmax.f32 %v2684_v9, 0.0 }
 0x23d   : > { %2736 = vst [vmem:[%s4120_s26 + $0x10] sm:$0xff] %v2720_v38 }
 0x240   : > { %v2685_v30 = vpop.f32.mrf.mxu2 }
 0x241   : > { %v2686_v39 = vadd.f32 %v4113_v27, %v2685_v30 }
 0x243   : > { %v2721_v37 = vmax.f32 %v2686_v39, 0.0 }
 0x245   : > { %2737 = vst [vmem:[%s4120_s26 + $0x18] sm:$0xff] %v2721_v37 }
 0x248   : > { %v2688_v41 = vpop.f32.mrf.mxu2 }
 0x249   : > { %v2689_v42 = vadd.f32 %v4113_v27, %v2688_v41 }
 0x24b   : > { %v2722_v44 = vmax.f32 %v2689_v42, 0.0 }
 0x24d   : > { %2738 = vst [vmem:[%s4120_s26 + $0x20] sm:$0xff] %v2722_v44 }
 0x250   : > { %v2690_v22 = vpop.f32.mrf.mxu2 }
 0x251   : > { %v2691_v43 = vadd.f32 %v4113_v27, %v2690_v22 }
 0x253   : > { %v2723_v12 = vmax.f32 %v2691_v43, 0.0 }
 0x255   : > { %2739 = vst [vmem:[%s4120_s26 + $0x28] sm:$0xff] %v2723_v12 }
 0x258   : > { %v2693_v54 = vpop.f32.mrf.mxu2 }
 0x259   : > { %v2694_v51 = vadd.f32 %v4113_v27, %v2693_v54 }
 0x25b   : > { %v2724_v61 = vmax.f32 %v2694_v51, 0.0 }
 0x25d   : > { %2740 = vst [vmem:[%s4120_s26 + $0x30] sm:$0xff] %v2724_v61 }
 0x260   : > { %v2695_v2 = vpop.f32.mrf.mxu2 }
 0x261   : > { %v2696_v21 = vadd.f32 %v4113_v27, %v2695_v2 }
 0x263   : > { %v2725_v33 = vmax.f32 %v2696_v21, 0.0 }
 0x265   : > { %2741 = vst [vmem:[%s4120_s26 + $0x38] sm:$0xff] %v2725_v33 }
 0x268   : > { %v2698_v47 = vpop.f32.mrf.mxu2 }
 0x269   : > { %v2699_v56 = vadd.f32 %v4113_v27, %v2698_v47 }
 0x26b   : > { %v2726_v58 = vmax.f32 %v2699_v56, 0.0 }
 0x26d   : > { %2742 = vst [vmem:[%s4120_s26 + $0x40] sm:$0xff] %v2726_v58 }
 0x270   : > { %v2700_v45 = vpop.f32.mrf.mxu2 }
 0x271   : > { %v2701_v60 = vadd.f32 %v4113_v27, %v2700_v45 }
 0x273   : > { %v2727_v0 = vmax.f32 %v2701_v60, 0.0 }
 0x275   : > { %2743 = vst [vmem:[%s4120_s26 + $0x48] sm:$0xff] %v2727_v0 }
 0x278   : > { %v2703_v59 = vpop.f32.mrf.mxu2 }
 0x279   : > { %v2704_v16 = vadd.f32 %v4113_v27, %v2703_v59 }
 0x27b   : > { %v2728_v5 = vmax.f32 %v2704_v16, 0.0 }
 0x27d   : > { %2744 = vst [vmem:[%s4120_s26 + $0x50] sm:$0xff] %v2728_v5 }
 0x280   : > { %v2705_v55 = vpop.f32.mrf.mxu2 }
 0x281   : > { %v2706_v7 = vadd.f32 %v4113_v27, %v2705_v55 }
 0x283   : > { %v2729_v8 = vmax.f32 %v2706_v7, 0.0 }
 0x285   : > { %2745 = vst [vmem:[%s4120_s26 + $0x58] sm:$0xff] %v2729_v8 }
 0x288   : > { %v2708_v17 = vpop.f32.mrf.mxu2 }
 0x289   : > { %v2709_v31 = vadd.f32 %v4113_v27, %v2708_v17 }
 0x28b   : > { %v2730_v28 = vmax.f32 %v2709_v31, 0.0 }
 0x28d   : > { %2746 = vst [vmem:[%s4120_s26 + $0x60] sm:$0xff] %v2730_v28 }
 0x290   : > { %v2710_v26 = vpop.f32.mrf.mxu2 }
 0x291   : > { %v2711_v19 = vadd.f32 %v4113_v27, %v2710_v26 }
 0x293   : > { %v2731_v11 = vmax.f32 %v2711_v19, 0.0 }
 0x295   : > { %2747 = vst [vmem:[%s4120_s26 + $0x68] sm:$0xff] %v2731_v11 }
 0x298   : > { %v2713_v29 = vpop.f32.mrf.mxu2 }
 0x299   : > { %v2714_v13 = vadd.f32 %v4113_v27, %v2713_v29 }
 0x29b   : > { %v2732_v10 = vmax.f32 %v2714_v13, 0.0 }
 0x29d   : > { %2748 = vst [vmem:[%s4120_s26 + $0x70] sm:$0xff] %v2732_v10 }
 0x2a0   : > { %v2715_v49 = vpop.f32.mrf.mxu2 }
 0x2a1   : > { %v2716_v57 = vadd.f32 %v4113_v27, %v2715_v49 }
 0x2a3   : > { %v2733_v63 = vmax.f32 %v2716_v57, 0.0 }
 0x2a5   : > { %2749 = vst [vmem:[%s4120_s26 + $0x78] sm:$0xff] %v2733_v63 }
 0x2a6 PF: > { %s17_s24 = sadd.s32 1, %s3304_s24  }
 0x2a7   : > { %p14_p4 = scmp.ge.s32.totalorder %s17_s24, 4  }
 0x2a9   :  { %16 = sbr.rel (!%p14_p4) target bundleno = 1 (0x1), region = 82 }

</bundles_post_ra>
